<compile_context>
chip_gen: v5e
topology: v5e:2x2
jax: 0.10.0
libtpu: 0.0.40
codegen_flags: <defaults>
</compile_context>

<pallas_src>
import functools

import jax
import jax.numpy as jnp
from jax.experimental import pallas as pl
from jax.experimental.pallas import tpu as pltpu


# ------------------------------- fused kernel ---------------------------------


def painn_kernel(
    # inputs
    s0_ref, ohj_hbm, ohiT_hbm, ef_hbm, graph_ohT_ref,
    wm1_ref, bm1_ref, wm2_ref, bm2_ref, wr_ref, br_ref,
    wuv_ref, buv_ref, wu1v_ref, wu1s_ref, bu1_ref, wu2_ref, bu2_ref,
    wo1_ref, bo1_ref, wo2_ref, bo2_ref,
    # output
    out_ref,
    # scratch
    s_sc, slab_sc, ohj_sc, ohiT_sc, ef_sc, delta_sc, copy_sem,
):
    layer = pl.program_id(0)
    N, F = s_sc.shape
    E = ohj_sc.shape[0]
    F3 = 3 * F
    bf16 = jnp.bfloat16

    # ---- one-time init (layer 0): state + single DMA of layer-invariant inputs ----
    @pl.when(layer == 0)
    def _init():
        s_sc[...] = s0_ref[...]
        slab_sc[...] = jnp.zeros_like(slab_sc)           # [phi | v], v starts at 0
        c0 = pltpu.make_async_copy(ohj_hbm, ohj_sc, copy_sem.at[0])
        c1 = pltpu.make_async_copy(ohiT_hbm, ohiT_sc, copy_sem.at[1])
        c2 = pltpu.make_async_copy(ef_hbm, ef_sc, copy_sem.at[2])
        c0.start(); c1.start(); c2.start()
        c0.wait(); c1.wait(); c2.wait()

    s = s_sc[...]                                        # (N, F)   f32
    ef = ef_sc[...]                                      # (E, 24)  f32
    feats_fc = ef[:, 0:20]                               # RBF(r) * fcut(r)
    fc = ef[:, 20:21]                                    # fcut(r)
    rn = ef[:, 21:24]                                    # r_hat

    # ============================== message block ===============================
    # rbf_layer(RBF(r)) * fc  ==  (RBF*fc) @ W + b*fc   (fc folded in the wrapper)
    rbf = (jnp.dot(feats_fc.astype(bf16), wr_ref[0],
                   preferred_element_type=jnp.float32) + br_ref[0] * fc)   # (E,3F)

    h = jnp.dot(s.astype(bf16), wm1_ref[0],
                preferred_element_type=jnp.float32) + bm1_ref[0]
    h = h * jax.nn.sigmoid(h)                            # SiLU (f32)
    phi = jnp.dot(h.astype(bf16), wm2_ref[0],
                  preferred_element_type=jnp.float32) + bm2_ref[0]         # (N,3F)

    # gather slab: [phi | v]; v permanently resident in lanes [3F:6F]
    slab_sc[:, 0:F3] = phi
    gathered = jnp.dot(ohj_sc[...], slab_sc[...].astype(bf16),
                       preferred_element_type=jnp.float32)                 # (E,6F)
    phi_j = gathered[:, 0:F3]
    v_j = gathered[:, F3:]

    po = rbf * phi_j                                     # (E,3F) [gate | ds | drep]
    gate_v = po[:, 0:F]
    delta_s = po[:, F:2 * F]
    delta_rep = po[:, 2 * F:F3]

    # delta slab [ds | dvx | dvy | dvz] assembled directly into bf16 scratch
    delta_sc[:, 0:F] = delta_s.astype(bf16)
    for d in range(3):
        dv = v_j[:, d * F:(d + 1) * F] * gate_v + rn[:, d:d + 1] * delta_rep
        delta_sc[:, (d + 1) * F:(d + 2) * F] = dv.astype(bf16)

    # fused scatter-add onto target nodes i (index_add): pre-transposed map, plain dot
    scat = jnp.dot(ohiT_sc[...], delta_sc[...],
                   preferred_element_type=jnp.float32)   # (N, 4F)
    s = s + scat[:, 0:F]
    v = slab_sc[:, F3:] + scat[:, F:]                    # (N, 3F) f32 [vx|vy|vz]

    # =============================== update block ===============================
    v_bf = v.astype(bf16)
    u_parts, vv_parts = [], []
    for d in range(3):
        uv = (jnp.dot(v_bf[:, d * F:(d + 1) * F], wuv_ref[0],
                      preferred_element_type=jnp.float32) + buv_ref[0])    # (N,2F) [U|V]
        u_parts.append(uv[:, 0:F])
        vv_parts.append(uv[:, F:])

    v_norm = jnp.sqrt(vv_parts[0] * vv_parts[0] + vv_parts[1] * vv_parts[1]
                      + vv_parts[2] * vv_parts[2])       # (N, F); norm over spatial axis
    # Linear(2F,F) split into two (F,F) matmuls -> no [v_norm | s] concat
    hu = (jnp.dot(v_norm.astype(bf16), wu1v_ref[0], preferred_element_type=jnp.float32)
          + jnp.dot(s.astype(bf16), wu1s_ref[0], preferred_element_type=jnp.float32)
          + bu1_ref[0])
    hu = hu * jax.nn.sigmoid(hu)                         # SiLU (f32)
    a = jnp.dot(hu.astype(bf16), wu2_ref[0],
                preferred_element_type=jnp.float32) + bu2_ref[0]           # (N,3F)
    avv = a[:, 0:F]
    asv = a[:, F:2 * F]
    ass = a[:, 2 * F:]

    product = (u_parts[0] * vv_parts[0] + u_parts[1] * vv_parts[1]
               + u_parts[2] * vv_parts[2])               # sum over spatial axis
    s_new = s + product * asv + ass
    s_sc[...] = s_new
    for d in range(3):
        slab_sc[:, F3 + d * F:F3 + (d + 1) * F] = v[:, d * F:(d + 1) * F] + avv * u_parts[d]

    # ========================= readout (last layer only) =========================
    # out_ref has a constant index_map: written once here, flushed to HBM at grid end.
    @pl.when(layer == pl.num_programs(0) - 1)
    def _readout():
        ho = (jnp.dot(s_new.astype(bf16), wo1_ref[...],
                      preferred_element_type=jnp.float32) + bo1_ref[...])
        ho = ho * jax.nn.sigmoid(ho)                     # SiLU
        e = (jnp.dot(ho.astype(bf16), wo2_ref[...],
                     preferred_element_type=jnp.float32) + bo2_ref[...])   # (N,1)
        # per-graph sum == outputs.index_add_(0, graph_idx, e); keep f32 for the output
        out_ref[...] = jnp.dot(graph_ohT_ref[...], e, preferred_element_type=jnp.float32)


# ------------------------------ call wrapper ----------------------------------


def painn_forward(z, edges, r_ij, r_ij_normalized, graph_idx, params, *,
                  r_cut, num_graphs):
    (emb, wm1, bm1, wm2, bm2, wr, br,
     wuv, buv, wu1, bu1, wu2, bu2, wo1, bo1, wo2, bo2) = params

    # TODO(synk): nn.Embedding lookup, one-hot construction and edge-feature packing are
    # plain-JAX glue outside the kernel.
    s0 = emb[z].astype(jnp.float32)                               # (N, F)
    N, F = s0.shape
    E = edges.shape[0]
    G = num_graphs
    n_layers = wm1.shape[0]
    bf16 = jnp.bfloat16

    node_ids = jnp.arange(N, dtype=jnp.int32)
    # gather map (source j = edges[:,1]) and PRE-TRANSPOSED scatter map (target i).
    oh_j = (node_ids[None, :] == edges[:, 1].astype(jnp.int32)[:, None]).astype(bf16)   # (E,N)
    oh_iT = (edges[:, 0].astype(jnp.int32)[None, :] == node_ids[:, None]).astype(bf16)  # (N,E)
    graph_ohT = (graph_idx.astype(jnp.int32)[None, :]
                 == jnp.arange(G, dtype=jnp.int32)[:, None]).astype(jnp.float32)        # (G,N)

    # Exact RBF / cosine cutoff, packed once: [RBF(r)*fc | fc | r_hat]  -> (E, 24)
    r = r_ij.astype(jnp.float32)
    rn = r_ij_normalized.astype(jnp.float32)
    n_vals = jnp.arange(1, 21, dtype=jnp.float32)[None, :]
    feats = jnp.sin(n_vals * (jnp.pi / r_cut) * r) / r            # exact (no approx recip)
    fc = 0.5 * (jnp.cos((jnp.pi / r_cut) * r) + 1.0)
    edge_feat = jnp.concatenate([feats * fc, fc, rn], axis=-1)    # (E, 24)

    # bf16 matmul operands (f32 accumulation in-kernel); biases stay f32.
    wu1v, wu1s = wu1[:, :F, :], wu1[:, F:, :]
    wm1b, wm2b, wrb, wuvb, wu1vb, wu1sb, wu2b, wo1b, wo2b = (
        w.astype(bf16) for w in (wm1, wm2, wr, wuv, wu1v, wu1s, wu2, wo1, wo2))

    def _const(l):
        return (0, 0)

    def _per_layer(l):
        return (l, 0, 0)

    layer_ws = (wm1b, bm1, wm2b, bm2, wrb, br, wuvb, buv, wu1vb, wu1sb, bu1, wu2b, bu2)
    in_specs = [
        pl.BlockSpec((N, F), _const),                 # s0
        pl.BlockSpec(memory_space=pl.ANY),            # oh_j   (E,N)  bf16 -> DMA'd once
        pl.BlockSpec(memory_space=pl.ANY),            # oh_i^T (N,E)  bf16 -> DMA'd once
        pl.BlockSpec(memory_space=pl.ANY),            # edge features (E,24) -> DMA'd once
        pl.BlockSpec((G, N), _const),                 # graph one-hot, pre-transposed
    ]
    in_specs += [pl.BlockSpec((1,) + w.shape[1:], _per_layer) for w in layer_ws]
    in_specs += [pl.BlockSpec(w.shape, _const) for w in (wo1b, bo1, wo2b, bo2)]

    grid_spec = pltpu.PrefetchScalarGridSpec(
        num_scalar_prefetch=0,
        grid=(n_layers,),                             # serial layer loop, state in VMEM
        in_specs=in_specs,
        out_specs=pl.BlockSpec((G, 1), _const),
        scratch_shapes=[
            pltpu.VMEM((N, F), jnp.float32),          # s  (resident across layers)
            pltpu.VMEM((N, 6 * F), jnp.float32),      # [phi | v] gather slab (v = state)
            pltpu.VMEM((E, N), bf16),                 # gather map, resident
            pltpu.VMEM((N, E), bf16),                 # scatter map (transposed), resident
            pltpu.VMEM((E, 24), jnp.float32),         # [RBF*fc | fc | r_hat], resident
            pltpu.VMEM((E, 4 * F), bf16),             # delta assembly slab
            pltpu.SemaphoreType.DMA((3,)),            # one-time input DMAs
        ],
    )

    return pl.pallas_call(
        painn_kernel,
        out_shape=jax.ShapeDtypeStruct((G, 1), jnp.float32),
        grid_spec=grid_spec,
        compiler_params=pltpu.CompilerParams(
            dimension_semantics=("arbitrary",),
            vmem_limit_bytes=32 * 1024 * 1024,
        ),
    )(s0, oh_j, oh_iT, edge_feat, graph_ohT,
      wm1b, bm1, wm2b, bm2, wrb, br, wuvb, buv, wu1vb, wu1sb, bu1, wu2b, bu2,
      wo1b, bo1, wo2b, bo2)


# --------------------------- deterministic params -----------------------------


def _dense(key, fan_in, shape):
    return jax.random.normal(key, shape, jnp.float32) / jnp.sqrt(jnp.float32(fan_in))


def init_params(key, F, n_layers):
    ks = jax.random.split(key, 17)
    emb = jax.random.normal(ks[0], (100, F), jnp.float32)
    wm1 = _dense(ks[1], F, (n_layers, F, F))          # message net Linear(F,F)
    bm1 = _dense(ks[2], F, (n_layers, 1, F))
    wm2 = _dense(ks[3], F, (n_layers, F, 3 * F))      # message net Linear(F,3F) fused
    bm2 = _dense(ks[4], F, (n_layers, 1, 3 * F))
    wr = _dense(ks[5], 20, (n_layers, 20, 3 * F))     # rbf_layer Linear(20,3F)
    br = _dense(ks[6], 20, (n_layers, 1, 3 * F))
    wuv = _dense(ks[7], F, (n_layers, F, 2 * F))      # update [U|V] fused
    buv = _dense(ks[8], F, (n_layers, 1, 2 * F))
    wu1 = _dense(ks[9], 2 * F, (n_layers, 2 * F, F))  # update net Linear(2F,F)
    bu1 = _dense(ks[10], 2 * F, (n_layers, 1, F))
    wu2 = _dense(ks[11], F, (n_layers, F, 3 * F))     # update net Linear(F,3F) fused
    bu2 = _dense(ks[12], F, (n_layers, 1, 3 * F))
    wo1 = _dense(ks[13], F, (F, F))                   # readout
    bo1 = _dense(ks[14], F, (1, F))
    wo2 = _dense(ks[15], F, (F, 1))
    bo2 = _dense(ks[16], F, (1, 1))
    return (emb, wm1, bm1, wm2, bm2, wr, br, wuv, buv, wu1, bu1, wu2, bu2,
            wo1, bo1, wo2, bo2)


# ---------------------------------- driver -------------------------------------


if __name__ == "__main__":
    N, E, G = 16, 48, 2               # atoms, edges, graphs (small demo)
    F = 128                           # module default embedding size (lane-aligned)
    N_BLOCKS = 3
    R_CUT = 5.0

    key = jax.random.PRNGKey(0)
    k_p, k_z, k_e, k_r, k_rn = jax.random.split(key, 5)

    params = init_params(k_p, F, N_BLOCKS)

    z = jax.random.randint(k_z, (N,), 0, 100)
    edges = jax.random.randint(k_e, (E, 2), 0, N)
    r_ij = jax.random.uniform(k_r, (E, 1), jnp.float32, minval=0.5, maxval=R_CUT)
    rn_raw = jax.random.normal(k_rn, (E, 3), jnp.float32)
    r_ij_normalized = rn_raw / jnp.linalg.norm(rn_raw, axis=1, keepdims=True)
    graph_idx = (jnp.arange(N) >= N // 2).astype(jnp.int32)   # two molecules

    fwd = jax.jit(functools.partial(painn_forward, r_cut=R_CUT, num_graphs=G))
    out = fwd(z, edges, r_ij, r_ij_normalized, graph_idx, params)
    jax.block_until_ready(out)
    assert out.shape == (G, 1)
    print("KERNEL_OK")
</pallas_src>

<mosaic_0001>
module attributes {stable_mosaic.version = 11 : i64} {
  func.func @painn_kernel(%arg0: i32, %arg1: memref<16x128xf32, #tpu.memory_space<vmem>>, %arg2: memref<48x16xbf16, #tpu.memory_space<any>>, %arg3: memref<16x48xbf16, #tpu.memory_space<any>>, %arg4: memref<48x24xf32, #tpu.memory_space<any>>, %arg5: memref<2x16xf32, #tpu.memory_space<vmem>>, %arg6: memref<1x128x128xbf16, #tpu.memory_space<vmem>>, %arg7: memref<1x1x128xf32, #tpu.memory_space<vmem>>, %arg8: memref<1x128x384xbf16, #tpu.memory_space<vmem>>, %arg9: memref<1x1x384xf32, #tpu.memory_space<vmem>>, %arg10: memref<1x20x384xbf16, #tpu.memory_space<vmem>>, %arg11: memref<1x1x384xf32, #tpu.memory_space<vmem>>, %arg12: memref<1x128x256xbf16, #tpu.memory_space<vmem>>, %arg13: memref<1x1x256xf32, #tpu.memory_space<vmem>>, %arg14: memref<1x128x128xbf16, #tpu.memory_space<vmem>>, %arg15: memref<1x128x128xbf16, #tpu.memory_space<vmem>>, %arg16: memref<1x1x128xf32, #tpu.memory_space<vmem>>, %arg17: memref<1x128x384xbf16, #tpu.memory_space<vmem>>, %arg18: memref<1x1x384xf32, #tpu.memory_space<vmem>>, %arg19: memref<128x128xbf16, #tpu.memory_space<vmem>>, %arg20: memref<1x128xf32, #tpu.memory_space<vmem>>, %arg21: memref<128x1xbf16, #tpu.memory_space<vmem>>, %arg22: memref<1x1xf32, #tpu.memory_space<vmem>>, %arg23: memref<2x1xf32, #tpu.memory_space<vmem>>, %arg24: memref<16x128xf32, #tpu.memory_space<vmem>>, %arg25: memref<16x768xf32, #tpu.memory_space<vmem>>, %arg26: memref<48x16xbf16, #tpu.memory_space<vmem>>, %arg27: memref<16x48xbf16, #tpu.memory_space<vmem>>, %arg28: memref<48x24xf32, #tpu.memory_space<vmem>>, %arg29: memref<48x512xbf16, #tpu.memory_space<vmem>>, %arg30: memref<3x!tpu.dma_semaphore, #tpu.memory_space<semaphore_mem>>) attributes {dimension_semantics = [#tpu.dimension_semantics<arbitrary>], iteration_bounds = array<i64: 3>, scalar_prefetch = 0 : i64, scratch_operands = 7 : i64, tpu.core_type = #tpu.core_type<tc>, window_params = [{pipeline_mode = #tpu.pipeline_mode<synchronous>, transform_indices = @transform_0, window_bounds = array<i64: 16, 128>}, {}, {}, {}, {pipeline_mode = #tpu.pipeline_mode<synchronous>, transform_indices = @transform_4, window_bounds = array<i64: 2, 16>}, {transform_indices = @transform_5, window_bounds = array<i64: 1, 128, 128>}, {transform_indices = @transform_6, window_bounds = array<i64: 1, 1, 128>}, {transform_indices = @transform_7, window_bounds = array<i64: 1, 128, 384>}, {transform_indices = @transform_8, window_bounds = array<i64: 1, 1, 384>}, {transform_indices = @transform_9, window_bounds = array<i64: 1, 20, 384>}, {transform_indices = @transform_10, window_bounds = array<i64: 1, 1, 384>}, {transform_indices = @transform_11, window_bounds = array<i64: 1, 128, 256>}, {transform_indices = @transform_12, window_bounds = array<i64: 1, 1, 256>}, {transform_indices = @transform_13, window_bounds = array<i64: 1, 128, 128>}, {transform_indices = @transform_14, window_bounds = array<i64: 1, 128, 128>}, {transform_indices = @transform_15, window_bounds = array<i64: 1, 1, 128>}, {transform_indices = @transform_16, window_bounds = array<i64: 1, 128, 384>}, {transform_indices = @transform_17, window_bounds = array<i64: 1, 1, 384>}, {pipeline_mode = #tpu.pipeline_mode<synchronous>, transform_indices = @transform_18, window_bounds = array<i64: 128, 128>}, {pipeline_mode = #tpu.pipeline_mode<synchronous>, transform_indices = @transform_19, window_bounds = array<i64: 1, 128>}, {pipeline_mode = #tpu.pipeline_mode<synchronous>, transform_indices = @transform_20, window_bounds = array<i64: 128, 1>}, {pipeline_mode = #tpu.pipeline_mode<synchronous>, transform_indices = @transform_21, window_bounds = array<i64: 1, 1>}, {pipeline_mode = #tpu.pipeline_mode<synchronous>, transform_indices = @transform_22, window_bounds = array<i64: 2, 1>}]} {
    %c0_i32 = arith.constant 0 : i32
    %0 = arith.cmpi eq, %arg0, %c0_i32 : i32
    %1 = arith.extui %0 : i1 to i32
    %c0_i32_0 = arith.constant 0 : i32
    %2 = arith.cmpi ne, %1, %c0_i32_0 : i32
    scf.if %2 {
      %c0_91 = arith.constant 0 : index
      %c0_92 = arith.constant 0 : index
      %176 = vector.load %arg1[%c0_91, %c0_92] : memref<16x128xf32, #tpu.memory_space<vmem>>, vector<16x128xf32>
      %c0_93 = arith.constant 0 : index
      %c0_94 = arith.constant 0 : index
      %177 = vector.load %arg24[%c0_93, %c0_94] : memref<16x128xf32, #tpu.memory_space<vmem>>, vector<16x128xf32>
      tpu.vector_store %arg24[%c0_93, %c0_94], %176 {strides = array<i32>} : memref<16x128xf32, #tpu.memory_space<vmem>>, vector<16x128xf32>,
      %cst_95 = arith.constant 0.000000e+00 : f32
      %178 = vector.broadcast %cst_95 : f32 to vector<16x768xf32>
      %c0_96 = arith.constant 0 : index
      %c0_97 = arith.constant 0 : index
      %179 = vector.load %arg25[%c0_96, %c0_97] : memref<16x768xf32, #tpu.memory_space<vmem>>, vector<16x768xf32>
      tpu.vector_store %arg25[%c0_96, %c0_97], %178 {strides = array<i32>} : memref<16x768xf32, #tpu.memory_space<vmem>>, vector<16x768xf32>,
      %c0_i32_98 = arith.constant 0 : i32
      %180 = tpu.memref_slice %arg30[%c0_i32_98] : memref<3x!tpu.dma_semaphore, #tpu.memory_space<semaphore_mem>> -> memref<1x!tpu.dma_semaphore, #tpu.memory_space<semaphore_mem>>
      %181 = tpu.memref_squeeze %180 : memref<1x!tpu.dma_semaphore, #tpu.memory_space<semaphore_mem>> -> memref<!tpu.dma_semaphore, #tpu.memory_space<semaphore_mem>>
      tpu.enqueue_dma source(%arg2 : memref<48x16xbf16, #tpu.memory_space<any>>) target(%arg26 : memref<48x16xbf16, #tpu.memory_space<vmem>>) target_semaphore(%181 : memref<!tpu.dma_semaphore, #tpu.memory_space<semaphore_mem>>)
      %c1_i32 = arith.constant 1 : i32
      %182 = tpu.memref_slice %arg30[%c1_i32] : memref<3x!tpu.dma_semaphore, #tpu.memory_space<semaphore_mem>> -> memref<1x!tpu.dma_semaphore, #tpu.memory_space<semaphore_mem>>
      %183 = tpu.memref_squeeze %182 : memref<1x!tpu.dma_semaphore, #tpu.memory_space<semaphore_mem>> -> memref<!tpu.dma_semaphore, #tpu.memory_space<semaphore_mem>>
      tpu.enqueue_dma source(%arg3 : memref<16x48xbf16, #tpu.memory_space<any>>) target(%arg27 : memref<16x48xbf16, #tpu.memory_space<vmem>>) target_semaphore(%183 : memref<!tpu.dma_semaphore, #tpu.memory_space<semaphore_mem>>)
      %c2_i32_99 = arith.constant 2 : i32
      %184 = tpu.memref_slice %arg30[%c2_i32_99] : memref<3x!tpu.dma_semaphore, #tpu.memory_space<semaphore_mem>> -> memref<1x!tpu.dma_semaphore, #tpu.memory_space<semaphore_mem>>
      %185 = tpu.memref_squeeze %184 : memref<1x!tpu.dma_semaphore, #tpu.memory_space<semaphore_mem>> -> memref<!tpu.dma_semaphore, #tpu.memory_space<semaphore_mem>>
      tpu.enqueue_dma source(%arg4 : memref<48x24xf32, #tpu.memory_space<any>>) target(%arg28 : memref<48x24xf32, #tpu.memory_space<vmem>>) target_semaphore(%185 : memref<!tpu.dma_semaphore, #tpu.memory_space<semaphore_mem>>)
      %c0_i32_100 = arith.constant 0 : i32
      %186 = tpu.memref_slice %arg30[%c0_i32_100] : memref<3x!tpu.dma_semaphore, #tpu.memory_space<semaphore_mem>> -> memref<1x!tpu.dma_semaphore, #tpu.memory_space<semaphore_mem>>
      %187 = tpu.memref_squeeze %186 : memref<1x!tpu.dma_semaphore, #tpu.memory_space<semaphore_mem>> -> memref<!tpu.dma_semaphore, #tpu.memory_space<semaphore_mem>>
      tpu.wait_dma2 semaphore(%187 : memref<!tpu.dma_semaphore, #tpu.memory_space<semaphore_mem>>) src(%arg2 : memref<48x16xbf16, #tpu.memory_space<any>>) dst(%arg26 : memref<48x16xbf16, #tpu.memory_space<vmem>>)
      %c1_i32_101 = arith.constant 1 : i32
      %188 = tpu.memref_slice %arg30[%c1_i32_101] : memref<3x!tpu.dma_semaphore, #tpu.memory_space<semaphore_mem>> -> memref<1x!tpu.dma_semaphore, #tpu.memory_space<semaphore_mem>>
      %189 = tpu.memref_squeeze %188 : memref<1x!tpu.dma_semaphore, #tpu.memory_space<semaphore_mem>> -> memref<!tpu.dma_semaphore, #tpu.memory_space<semaphore_mem>>
      tpu.wait_dma2 semaphore(%189 : memref<!tpu.dma_semaphore, #tpu.memory_space<semaphore_mem>>) src(%arg3 : memref<16x48xbf16, #tpu.memory_space<any>>) dst(%arg27 : memref<16x48xbf16, #tpu.memory_space<vmem>>)
      %c2_i32_102 = arith.constant 2 : i32
      %190 = tpu.memref_slice %arg30[%c2_i32_102] : memref<3x!tpu.dma_semaphore, #tpu.memory_space<semaphore_mem>> -> memref<1x!tpu.dma_semaphore, #tpu.memory_space<semaphore_mem>>
      %191 = tpu.memref_squeeze %190 : memref<1x!tpu.dma_semaphore, #tpu.memory_space<semaphore_mem>> -> memref<!tpu.dma_semaphore, #tpu.memory_space<semaphore_mem>>
      tpu.wait_dma2 semaphore(%191 : memref<!tpu.dma_semaphore, #tpu.memory_space<semaphore_mem>>) src(%arg4 : memref<48x24xf32, #tpu.memory_space<any>>) dst(%arg28 : memref<48x24xf32, #tpu.memory_space<vmem>>)
    } else {
    }
    %c0 = arith.constant 0 : index
    %c0_1 = arith.constant 0 : index
    %3 = vector.load %arg24[%c0, %c0_1] : memref<16x128xf32, #tpu.memory_space<vmem>>, vector<16x128xf32>
    %c0_2 = arith.constant 0 : index
    %c0_3 = arith.constant 0 : index
    %4 = vector.load %arg28[%c0_2, %c0_3] : memref<48x24xf32, #tpu.memory_space<vmem>>, vector<48x24xf32>
    %5 = vector.extract_strided_slice %4 {offsets = [0, 0], sizes = [48, 20], strides = [1, 1]} : vector<48x24xf32> to vector<48x20xf32>
    %6 = vector.extract_strided_slice %4 {offsets = [0, 20], sizes = [48, 1], strides = [1, 1]} : vector<48x24xf32> to vector<48x1xf32>
    %7 = vector.extract_strided_slice %4 {offsets = [0, 21], sizes = [48, 3], strides = [1, 1]} : vector<48x24xf32> to vector<48x3xf32>
    %8 = arith.truncf %5 : vector<48x20xf32> to vector<48x20xbf16>
    %c0_4 = arith.constant 0 : index
    %c0_5 = arith.constant 0 : index
    %c0_6 = arith.constant 0 : index
    %9 = vector.load %arg10[%c0_4, %c0_5, %c0_6] : memref<1x20x384xbf16, #tpu.memory_space<vmem>>, vector<1x20x384xbf16>
    %10 = vector.shape_cast %9 : vector<1x20x384xbf16> to vector<20x384xbf16>
    %cst = arith.constant dense<0.000000e+00> : vector<48x384xf32>
    %11 = tpu.matmul %8, %10, %cst {dimension_numbers = #tpu.dot_dimension_numbers<[1], [0], [0], [1], [0, 0, 1, 1], [], []>} : vector<48x20xbf16>, vector<20x384xbf16>, vector<48x384xf32> -> vector<48x384xf32>
    %c0_7 = arith.constant 0 : index
    %c0_8 = arith.constant 0 : index
    %c0_9 = arith.constant 0 : index
    %12 = vector.load %arg11[%c0_7, %c0_8, %c0_9] : memref<1x1x384xf32, #tpu.memory_space<vmem>>, vector<1x1x384xf32>
    %13 = vector.shape_cast %12 : vector<1x1x384xf32> to vector<1x384xf32>
    %14 = vector.broadcast %13 : vector<1x384xf32> to vector<48x384xf32>
    %15 = vector.broadcast %6 : vector<48x1xf32> to vector<48x384xf32>
    %16 = arith.mulf %14, %15 : vector<48x384xf32>
    %17 = arith.addf %11, %16 : vector<48x384xf32>
    %18 = arith.truncf %3 : vector<16x128xf32> to vector<16x128xbf16>
    %c0_10 = arith.constant 0 : index
    %c0_11 = arith.constant 0 : index
    %c0_12 = arith.constant 0 : index
    %19 = vector.load %arg6[%c0_10, %c0_11, %c0_12] : memref<1x128x128xbf16, #tpu.memory_space<vmem>>, vector<1x128x128xbf16>
    %20 = vector.shape_cast %19 : vector<1x128x128xbf16> to vector<128x128xbf16>
    %cst_13 = arith.constant dense<0.000000e+00> : vector<16x128xf32>
    %21 = tpu.matmul %18, %20, %cst_13 {dimension_numbers = #tpu.dot_dimension_numbers<[1], [0], [0], [1], [0, 0, 1, 1], [], []>} : vector<16x128xbf16>, vector<128x128xbf16>, vector<16x128xf32> -> vector<16x128xf32>
    %c0_14 = arith.constant 0 : index
    %c0_15 = arith.constant 0 : index
    %c0_16 = arith.constant 0 : index
    %22 = vector.load %arg7[%c0_14, %c0_15, %c0_16] : memref<1x1x128xf32, #tpu.memory_space<vmem>>, vector<1x1x128xf32>
    %23 = vector.shape_cast %22 : vector<1x1x128xf32> to vector<1x128xf32>
    %24 = vector.broadcast %23 : vector<1x128xf32> to vector<16x128xf32>
    %25 = arith.addf %21, %24 : vector<16x128xf32>
    %26 = arith.negf %25 : vector<16x128xf32>
    %27 = math.exp %26 : vector<16x128xf32>
    %cst_17 = arith.constant 1.000000e+00 : f32
    %28 = vector.broadcast %cst_17 : f32 to vector<16x128xf32>
    %29 = arith.addf %28, %27 : vector<16x128xf32>
    %30 = arith.divf %28, %29 : vector<16x128xf32>
    %31 = arith.mulf %25, %30 : vector<16x128xf32>
    %32 = arith.truncf %31 : vector<16x128xf32> to vector<16x128xbf16>
    %c0_18 = arith.constant 0 : index
    %c0_19 = arith.constant 0 : index
    %c0_20 = arith.constant 0 : index
    %33 = vector.load %arg8[%c0_18, %c0_19, %c0_20] : memref<1x128x384xbf16, #tpu.memory_space<vmem>>, vector<1x128x384xbf16>
    %34 = vector.shape_cast %33 : vector<1x128x384xbf16> to vector<128x384xbf16>
    %cst_21 = arith.constant dense<0.000000e+00> : vector<16x384xf32>
    %35 = tpu.matmul %32, %34, %cst_21 {dimension_numbers = #tpu.dot_dimension_numbers<[1], [0], [0], [1], [0, 0, 1, 1], [], []>} : vector<16x128xbf16>, vector<128x384xbf16>, vector<16x384xf32> -> vector<16x384xf32>
    %c0_22 = arith.constant 0 : index
    %c0_23 = arith.constant 0 : index
    %c0_24 = arith.constant 0 : index
    %36 = vector.load %arg9[%c0_22, %c0_23, %c0_24] : memref<1x1x384xf32, #tpu.memory_space<vmem>>, vector<1x1x384xf32>
    %37 = vector.shape_cast %36 : vector<1x1x384xf32> to vector<1x384xf32>
    %38 = vector.broadcast %37 : vector<1x384xf32> to vector<16x384xf32>
    %39 = arith.addf %35, %38 : vector<16x384xf32>
    %c0_25 = arith.constant 0 : index
    %c0_26 = arith.constant 0 : index
    %40 = vector.load %arg25[%c0_25, %c0_26] : memref<16x768xf32, #tpu.memory_space<vmem>>, vector<16x384xf32>
    tpu.vector_store %arg25[%c0_25, %c0_26], %39 {strides = array<i32>} : memref<16x768xf32, #tpu.memory_space<vmem>>, vector<16x384xf32>,
    %c0_27 = arith.constant 0 : index
    %c0_28 = arith.constant 0 : index
    %41 = vector.load %arg26[%c0_27, %c0_28] : memref<48x16xbf16, #tpu.memory_space<vmem>>, vector<48x16xbf16>
    %c0_29 = arith.constant 0 : index
    %c0_30 = arith.constant 0 : index
    %42 = vector.load %arg25[%c0_29, %c0_30] : memref<16x768xf32, #tpu.memory_space<vmem>>, vector<16x768xf32>
    %43 = arith.truncf %42 : vector<16x768xf32> to vector<16x768xbf16>
    %cst_31 = arith.constant dense<0.000000e+00> : vector<48x768xf32>
    %44 = tpu.matmul %41, %43, %cst_31 {dimension_numbers = #tpu.dot_dimension_numbers<[1], [0], [0], [1], [0, 0, 1, 1], [], []>} : vector<48x16xbf16>, vector<16x768xbf16>, vector<48x768xf32> -> vector<48x768xf32>
    %45 = vector.extract_strided_slice %44 {offsets = [0, 0], sizes = [48, 384], strides = [1, 1]} : vector<48x768xf32> to vector<48x384xf32>
    %46 = vector.extract_strided_slice %44 {offsets = [0, 384], sizes = [48, 384], strides = [1, 1]} : vector<48x768xf32> to vector<48x384xf32>
    %47 = arith.mulf %17, %45 : vector<48x384xf32>
    %48 = vector.extract_strided_slice %47 {offsets = [0, 0], sizes = [48, 128], strides = [1, 1]} : vector<48x384xf32> to vector<48x128xf32>
    %49 = vector.extract_strided_slice %47 {offsets = [0, 128], sizes = [48, 128], strides = [1, 1]} : vector<48x384xf32> to vector<48x128xf32>
    %50 = vector.extract_strided_slice %47 {offsets = [0, 256], sizes = [48, 128], strides = [1, 1]} : vector<48x384xf32> to vector<48x128xf32>
    %51 = arith.truncf %49 : vector<48x128xf32> to vector<48x128xbf16>
    %c0_32 = arith.constant 0 : index
    %c0_33 = arith.constant 0 : index
    %52 = vector.load %arg29[%c0_32, %c0_33] : memref<48x512xbf16, #tpu.memory_space<vmem>>, vector<48x128xbf16>
    tpu.vector_store %arg29[%c0_32, %c0_33], %51 {strides = array<i32>} : memref<48x512xbf16, #tpu.memory_space<vmem>>, vector<48x128xbf16>,
    %53 = vector.extract_strided_slice %46 {offsets = [0, 0], sizes = [48, 128], strides = [1, 1]} : vector<48x384xf32> to vector<48x128xf32>
    %54 = arith.mulf %53, %48 : vector<48x128xf32>
    %55 = vector.extract_strided_slice %7 {offsets = [0, 0], sizes = [48, 1], strides = [1, 1]} : vector<48x3xf32> to vector<48x1xf32>
    %56 = vector.broadcast %55 : vector<48x1xf32> to vector<48x128xf32>
    %57 = arith.mulf %56, %50 : vector<48x128xf32>
    %58 = arith.addf %54, %57 : vector<48x128xf32>
    %59 = arith.truncf %58 : vector<48x128xf32> to vector<48x128xbf16>
    %c0_34 = arith.constant 0 : index
    %c128 = arith.constant 128 : index
    %60 = vector.load %arg29[%c0_34, %c128] : memref<48x512xbf16, #tpu.memory_space<vmem>>, vector<48x128xbf16>
    tpu.vector_store %arg29[%c0_34, %c128], %59 {strides = array<i32>} : memref<48x512xbf16, #tpu.memory_space<vmem>>, vector<48x128xbf16>,
    %61 = vector.extract_strided_slice %46 {offsets = [0, 128], sizes = [48, 128], strides = [1, 1]} : vector<48x384xf32> to vector<48x128xf32>
    %62 = arith.mulf %61, %48 : vector<48x128xf32>
    %63 = vector.extract_strided_slice %7 {offsets = [0, 1], sizes = [48, 1], strides = [1, 1]} : vector<48x3xf32> to vector<48x1xf32>
    %64 = vector.broadcast %63 : vector<48x1xf32> to vector<48x128xf32>
    %65 = arith.mulf %64, %50 : vector<48x128xf32>
    %66 = arith.addf %62, %65 : vector<48x128xf32>
    %67 = arith.truncf %66 : vector<48x128xf32> to vector<48x128xbf16>
    %c0_35 = arith.constant 0 : index
    %c256 = arith.constant 256 : index
    %68 = vector.load %arg29[%c0_35, %c256] : memref<48x512xbf16, #tpu.memory_space<vmem>>, vector<48x128xbf16>
    tpu.vector_store %arg29[%c0_35, %c256], %67 {strides = array<i32>} : memref<48x512xbf16, #tpu.memory_space<vmem>>, vector<48x128xbf16>,
    %69 = vector.extract_strided_slice %46 {offsets = [0, 256], sizes = [48, 128], strides = [1, 1]} : vector<48x384xf32> to vector<48x128xf32>
    %70 = arith.mulf %69, %48 : vector<48x128xf32>
    %71 = vector.extract_strided_slice %7 {offsets = [0, 2], sizes = [48, 1], strides = [1, 1]} : vector<48x3xf32> to vector<48x1xf32>
    %72 = vector.broadcast %71 : vector<48x1xf32> to vector<48x128xf32>
    %73 = arith.mulf %72, %50 : vector<48x128xf32>
    %74 = arith.addf %70, %73 : vector<48x128xf32>
    %75 = arith.truncf %74 : vector<48x128xf32> to vector<48x128xbf16>
    %c0_36 = arith.constant 0 : index
    %c384 = arith.constant 384 : index
    %76 = vector.load %arg29[%c0_36, %c384] : memref<48x512xbf16, #tpu.memory_space<vmem>>, vector<48x128xbf16>
    tpu.vector_store %arg29[%c0_36, %c384], %75 {strides = array<i32>} : memref<48x512xbf16, #tpu.memory_space<vmem>>, vector<48x128xbf16>,
    %c0_37 = arith.constant 0 : index
    %c0_38 = arith.constant 0 : index
    %77 = vector.load %arg27[%c0_37, %c0_38] : memref<16x48xbf16, #tpu.memory_space<vmem>>, vector<16x48xbf16>
    %c0_39 = arith.constant 0 : index
    %c0_40 = arith.constant 0 : index
    %78 = vector.load %arg29[%c0_39, %c0_40] : memref<48x512xbf16, #tpu.memory_space<vmem>>, vector<48x512xbf16>
    %cst_41 = arith.constant dense<0.000000e+00> : vector<16x512xf32>
    %79 = tpu.matmul %77, %78, %cst_41 {dimension_numbers = #tpu.dot_dimension_numbers<[1], [0], [0], [1], [0, 0, 1, 1], [], []>} : vector<16x48xbf16>, vector<48x512xbf16>, vector<16x512xf32> -> vector<16x512xf32>
    %80 = vector.extract_strided_slice %79 {offsets = [0, 0], sizes = [16, 128], strides = [1, 1]} : vector<16x512xf32> to vector<16x128xf32>
    %81 = arith.addf %3, %80 : vector<16x128xf32>
    %c0_42 = arith.constant 0 : index
    %c384_43 = arith.constant 384 : index
    %82 = vector.load %arg25[%c0_42, %c384_43] : memref<16x768xf32, #tpu.memory_space<vmem>>, vector<16x384xf32>
    %83 = vector.extract_strided_slice %79 {offsets = [0, 128], sizes = [16, 384], strides = [1, 1]} : vector<16x512xf32> to vector<16x384xf32>
    %84 = arith.addf %82, %83 : vector<16x384xf32>
    %85 = arith.truncf %84 : vector<16x384xf32> to vector<16x384xbf16>
    %86 = vector.extract_strided_slice %85 {offsets = [0, 0], sizes = [16, 128], strides = [1, 1]} : vector<16x384xbf16> to vector<16x128xbf16>
    %c0_44 = arith.constant 0 : index
    %c0_45 = arith.constant 0 : index
    %c0_46 = arith.constant 0 : index
    %87 = vector.load %arg12[%c0_44, %c0_45, %c0_46] : memref<1x128x256xbf16, #tpu.memory_space<vmem>>, vector<1x128x256xbf16>
    %88 = vector.shape_cast %87 : vector<1x128x256xbf16> to vector<128x256xbf16>
    %cst_47 = arith.constant dense<0.000000e+00> : vector<16x256xf32>
    %89 = tpu.matmul %86, %88, %cst_47 {dimension_numbers = #tpu.dot_dimension_numbers<[1], [0], [0], [1], [0, 0, 1, 1], [], []>} : vector<16x128xbf16>, vector<128x256xbf16>, vector<16x256xf32> -> vector<16x256xf32>
    %c0_48 = arith.constant 0 : index
    %c0_49 = arith.constant 0 : index
    %c0_50 = arith.constant 0 : index
    %90 = vector.load %arg13[%c0_48, %c0_49, %c0_50] : memref<1x1x256xf32, #tpu.memory_space<vmem>>, vector<1x1x256xf32>
    %91 = vector.shape_cast %90 : vector<1x1x256xf32> to vector<1x256xf32>
    %92 = vector.broadcast %91 : vector<1x256xf32> to vector<16x256xf32>
    %93 = arith.addf %89, %92 : vector<16x256xf32>
    %94 = vector.extract_strided_slice %93 {offsets = [0, 0], sizes = [16, 128], strides = [1, 1]} : vector<16x256xf32> to vector<16x128xf32>
    %95 = vector.extract_strided_slice %93 {offsets = [0, 128], sizes = [16, 128], strides = [1, 1]} : vector<16x256xf32> to vector<16x128xf32>
    %96 = vector.extract_strided_slice %85 {offsets = [0, 128], sizes = [16, 128], strides = [1, 1]} : vector<16x384xbf16> to vector<16x128xbf16>
    %c0_51 = arith.constant 0 : index
    %c0_52 = arith.constant 0 : index
    %c0_53 = arith.constant 0 : index
    %97 = vector.load %arg12[%c0_51, %c0_52, %c0_53] : memref<1x128x256xbf16, #tpu.memory_space<vmem>>, vector<1x128x256xbf16>
    %98 = vector.shape_cast %97 : vector<1x128x256xbf16> to vector<128x256xbf16>
    %cst_54 = arith.constant dense<0.000000e+00> : vector<16x256xf32>
    %99 = tpu.matmul %96, %98, %cst_54 {dimension_numbers = #tpu.dot_dimension_numbers<[1], [0], [0], [1], [0, 0, 1, 1], [], []>} : vector<16x128xbf16>, vector<128x256xbf16>, vector<16x256xf32> -> vector<16x256xf32>
    %c0_55 = arith.constant 0 : index
    %c0_56 = arith.constant 0 : index
    %c0_57 = arith.constant 0 : index
    %100 = vector.load %arg13[%c0_55, %c0_56, %c0_57] : memref<1x1x256xf32, #tpu.memory_space<vmem>>, vector<1x1x256xf32>
    %101 = vector.shape_cast %100 : vector<1x1x256xf32> to vector<1x256xf32>
    %102 = vector.broadcast %101 : vector<1x256xf32> to vector<16x256xf32>
    %103 = arith.addf %99, %102 : vector<16x256xf32>
    %104 = vector.extract_strided_slice %103 {offsets = [0, 0], sizes = [16, 128], strides = [1, 1]} : vector<16x256xf32> to vector<16x128xf32>
    %105 = vector.extract_strided_slice %103 {offsets = [0, 128], sizes = [16, 128], strides = [1, 1]} : vector<16x256xf32> to vector<16x128xf32>
    %106 = vector.extract_strided_slice %85 {offsets = [0, 256], sizes = [16, 128], strides = [1, 1]} : vector<16x384xbf16> to vector<16x128xbf16>
    %c0_58 = arith.constant 0 : index
    %c0_59 = arith.constant 0 : index
    %c0_60 = arith.constant 0 : index
    %107 = vector.load %arg12[%c0_58, %c0_59, %c0_60] : memref<1x128x256xbf16, #tpu.memory_space<vmem>>, vector<1x128x256xbf16>
    %108 = vector.shape_cast %107 : vector<1x128x256xbf16> to vector<128x256xbf16>
    %cst_61 = arith.constant dense<0.000000e+00> : vector<16x256xf32>
    %109 = tpu.matmul %106, %108, %cst_61 {dimension_numbers = #tpu.dot_dimension_numbers<[1], [0], [0], [1], [0, 0, 1, 1], [], []>} : vector<16x128xbf16>, vector<128x256xbf16>, vector<16x256xf32> -> vector<16x256xf32>
    %c0_62 = arith.constant 0 : index
    %c0_63 = arith.constant 0 : index
    %c0_64 = arith.constant 0 : index
    %110 = vector.load %arg13[%c0_62, %c0_63, %c0_64] : memref<1x1x256xf32, #tpu.memory_space<vmem>>, vector<1x1x256xf32>
    %111 = vector.shape_cast %110 : vector<1x1x256xf32> to vector<1x256xf32>
    %112 = vector.broadcast %111 : vector<1x256xf32> to vector<16x256xf32>
    %113 = arith.addf %109, %112 : vector<16x256xf32>
    %114 = vector.extract_strided_slice %113 {offsets = [0, 0], sizes = [16, 128], strides = [1, 1]} : vector<16x256xf32> to vector<16x128xf32>
    %115 = vector.extract_strided_slice %113 {offsets = [0, 128], sizes = [16, 128], strides = [1, 1]} : vector<16x256xf32> to vector<16x128xf32>
    %116 = arith.mulf %95, %95 : vector<16x128xf32>
    %117 = arith.mulf %105, %105 : vector<16x128xf32>
    %118 = arith.addf %116, %117 : vector<16x128xf32>
    %119 = arith.mulf %115, %115 : vector<16x128xf32>
    %120 = arith.addf %118, %119 : vector<16x128xf32>
    %121 = math.sqrt %120 : vector<16x128xf32>
    %122 = arith.truncf %121 : vector<16x128xf32> to vector<16x128xbf16>
    %c0_65 = arith.constant 0 : index
    %c0_66 = arith.constant 0 : index
    %c0_67 = arith.constant 0 : index
    %123 = vector.load %arg14[%c0_65, %c0_66, %c0_67] : memref<1x128x128xbf16, #tpu.memory_space<vmem>>, vector<1x128x128xbf16>
    %124 = vector.shape_cast %123 : vector<1x128x128xbf16> to vector<128x128xbf16>
    %cst_68 = arith.constant dense<0.000000e+00> : vector<16x128xf32>
    %125 = tpu.matmul %122, %124, %cst_68 {dimension_numbers = #tpu.dot_dimension_numbers<[1], [0], [0], [1], [0, 0, 1, 1], [], []>} : vector<16x128xbf16>, vector<128x128xbf16>, vector<16x128xf32> -> vector<16x128xf32>
    %126 = arith.truncf %81 : vector<16x128xf32> to vector<16x128xbf16>
    %c0_69 = arith.constant 0 : index
    %c0_70 = arith.constant 0 : index
    %c0_71 = arith.constant 0 : index
    %127 = vector.load %arg15[%c0_69, %c0_70, %c0_71] : memref<1x128x128xbf16, #tpu.memory_space<vmem>>, vector<1x128x128xbf16>
    %128 = vector.shape_cast %127 : vector<1x128x128xbf16> to vector<128x128xbf16>
    %cst_72 = arith.constant dense<0.000000e+00> : vector<16x128xf32>
    %129 = tpu.matmul %126, %128, %cst_72 {dimension_numbers = #tpu.dot_dimension_numbers<[1], [0], [0], [1], [0, 0, 1, 1], [], []>} : vector<16x128xbf16>, vector<128x128xbf16>, vector<16x128xf32> -> vector<16x128xf32>
    %130 = arith.addf %125, %129 : vector<16x128xf32>
    %c0_73 = arith.constant 0 : index
    %c0_74 = arith.constant 0 : index
    %c0_75 = arith.constant 0 : index
    %131 = vector.load %arg16[%c0_73, %c0_74, %c0_75] : memref<1x1x128xf32, #tpu.memory_space<vmem>>, vector<1x1x128xf32>
    %132 = vector.shape_cast %131 : vector<1x1x128xf32> to vector<1x128xf32>
    %133 = vector.broadcast %132 : vector<1x128xf32> to vector<16x128xf32>
    %134 = arith.addf %130, %133 : vector<16x128xf32>
    %135 = arith.negf %134 : vector<16x128xf32>
    %136 = math.exp %135 : vector<16x128xf32>
    %cst_76 = arith.constant 1.000000e+00 : f32
    %137 = vector.broadcast %cst_76 : f32 to vector<16x128xf32>
    %138 = arith.addf %137, %136 : vector<16x128xf32>
    %139 = arith.divf %137, %138 : vector<16x128xf32>
    %140 = arith.mulf %134, %139 : vector<16x128xf32>
    %141 = arith.truncf %140 : vector<16x128xf32> to vector<16x128xbf16>
    %c0_77 = arith.constant 0 : index
    %c0_78 = arith.constant 0 : index
    %c0_79 = arith.constant 0 : index
    %142 = vector.load %arg17[%c0_77, %c0_78, %c0_79] : memref<1x128x384xbf16, #tpu.memory_space<vmem>>, vector<1x128x384xbf16>
    %143 = vector.shape_cast %142 : vector<1x128x384xbf16> to vector<128x384xbf16>
    %cst_80 = arith.constant dense<0.000000e+00> : vector<16x384xf32>
    %144 = tpu.matmul %141, %143, %cst_80 {dimension_numbers = #tpu.dot_dimension_numbers<[1], [0], [0], [1], [0, 0, 1, 1], [], []>} : vector<16x128xbf16>, vector<128x384xbf16>, vector<16x384xf32> -> vector<16x384xf32>
    %c0_81 = arith.constant 0 : index
    %c0_82 = arith.constant 0 : index
    %c0_83 = arith.constant 0 : index
    %145 = vector.load %arg18[%c0_81, %c0_82, %c0_83] : memref<1x1x384xf32, #tpu.memory_space<vmem>>, vector<1x1x384xf32>
    %146 = vector.shape_cast %145 : vector<1x1x384xf32> to vector<1x384xf32>
    %147 = vector.broadcast %146 : vector<1x384xf32> to vector<16x384xf32>
    %148 = arith.addf %144, %147 : vector<16x384xf32>
    %149 = vector.extract_strided_slice %148 {offsets = [0, 0], sizes = [16, 128], strides = [1, 1]} : vector<16x384xf32> to vector<16x128xf32>
    %150 = vector.extract_strided_slice %148 {offsets = [0, 128], sizes = [16, 128], strides = [1, 1]} : vector<16x384xf32> to vector<16x128xf32>
    %151 = vector.extract_strided_slice %148 {offsets = [0, 256], sizes = [16, 128], strides = [1, 1]} : vector<16x384xf32> to vector<16x128xf32>
    %152 = arith.mulf %94, %95 : vector<16x128xf32>
    %153 = arith.mulf %104, %105 : vector<16x128xf32>
    %154 = arith.addf %152, %153 : vector<16x128xf32>
    %155 = arith.mulf %114, %115 : vector<16x128xf32>
    %156 = arith.addf %154, %155 : vector<16x128xf32>
    %157 = arith.mulf %156, %150 : vector<16x128xf32>
    %158 = arith.addf %81, %157 : vector<16x128xf32>
    %159 = arith.addf %158, %151 : vector<16x128xf32>
    %c0_84 = arith.constant 0 : index
    %c0_85 = arith.constant 0 : index
    %160 = vector.load %arg24[%c0_84, %c0_85] : memref<16x128xf32, #tpu.memory_space<vmem>>, vector<16x128xf32>
    tpu.vector_store %arg24[%c0_84, %c0_85], %159 {strides = array<i32>} : memref<16x128xf32, #tpu.memory_space<vmem>>, vector<16x128xf32>,
    %161 = vector.extract_strided_slice %84 {offsets = [0, 0], sizes = [16, 128], strides = [1, 1]} : vector<16x384xf32> to vector<16x128xf32>
    %162 = arith.mulf %149, %94 : vector<16x128xf32>
    %163 = arith.addf %161, %162 : vector<16x128xf32>
    %c0_86 = arith.constant 0 : index
    %c384_87 = arith.constant 384 : index
    %164 = vector.load %arg25[%c0_86, %c384_87] : memref<16x768xf32, #tpu.memory_space<vmem>>, vector<16x128xf32>
    tpu.vector_store %arg25[%c0_86, %c384_87], %163 {strides = array<i32>} : memref<16x768xf32, #tpu.memory_space<vmem>>, vector<16x128xf32>,
    %165 = vector.extract_strided_slice %84 {offsets = [0, 128], sizes = [16, 128], strides = [1, 1]} : vector<16x384xf32> to vector<16x128xf32>
    %166 = arith.mulf %149, %104 : vector<16x128xf32>
    %167 = arith.addf %165, %166 : vector<16x128xf32>
    %c0_88 = arith.constant 0 : index
    %c512 = arith.constant 512 : index
    %168 = vector.load %arg25[%c0_88, %c512] : memref<16x768xf32, #tpu.memory_space<vmem>>, vector<16x128xf32>
    tpu.vector_store %arg25[%c0_88, %c512], %167 {strides = array<i32>} : memref<16x768xf32, #tpu.memory_space<vmem>>, vector<16x128xf32>,
    %169 = vector.extract_strided_slice %84 {offsets = [0, 256], sizes = [16, 128], strides = [1, 1]} : vector<16x384xf32> to vector<16x128xf32>
    %170 = arith.mulf %149, %114 : vector<16x128xf32>
    %171 = arith.addf %169, %170 : vector<16x128xf32>
    %c0_89 = arith.constant 0 : index
    %c640 = arith.constant 640 : index
    %172 = vector.load %arg25[%c0_89, %c640] : memref<16x768xf32, #tpu.memory_space<vmem>>, vector<16x128xf32>
    tpu.vector_store %arg25[%c0_89, %c640], %171 {strides = array<i32>} : memref<16x768xf32, #tpu.memory_space<vmem>>, vector<16x128xf32>,
    %c2_i32 = arith.constant 2 : i32
    %173 = arith.cmpi eq, %arg0, %c2_i32 : i32
    %174 = arith.extui %173 : i1 to i32
    %c0_i32_90 = arith.constant 0 : i32
    %175 = arith.cmpi ne, %174, %c0_i32_90 : i32
    scf.if %175 {
      %176 = arith.truncf %159 : vector<16x128xf32> to vector<16x128xbf16>
      %c0_91 = arith.constant 0 : index
      %c0_92 = arith.constant 0 : index
      %177 = vector.load %arg19[%c0_91, %c0_92] : memref<128x128xbf16, #tpu.memory_space<vmem>>, vector<128x128xbf16>
      %cst_93 = arith.constant dense<0.000000e+00> : vector<16x128xf32>
      %178 = tpu.matmul %176, %177, %cst_93 {dimension_numbers = #tpu.dot_dimension_numbers<[1], [0], [0], [1], [0, 0, 1, 1], [], []>} : vector<16x128xbf16>, vector<128x128xbf16>, vector<16x128xf32> -> vector<16x128xf32>
      %c0_94 = arith.constant 0 : index
      %c0_95 = arith.constant 0 : index
      %179 = vector.load %arg20[%c0_94, %c0_95] : memref<1x128xf32, #tpu.memory_space<vmem>>, vector<1x128xf32>
      %180 = vector.broadcast %179 : vector<1x128xf32> to vector<16x128xf32>
      %181 = arith.addf %178, %180 : vector<16x128xf32>
      %182 = arith.negf %181 : vector<16x128xf32>
      %183 = math.exp %182 : vector<16x128xf32>
      %cst_96 = arith.constant 1.000000e+00 : f32
      %184 = vector.broadcast %cst_96 : f32 to vector<16x128xf32>
      %185 = arith.addf %184, %183 : vector<16x128xf32>
      %186 = arith.divf %184, %185 : vector<16x128xf32>
      %187 = arith.mulf %181, %186 : vector<16x128xf32>
      %188 = arith.truncf %187 : vector<16x128xf32> to vector<16x128xbf16>
      %c0_97 = arith.constant 0 : index
      %c0_98 = arith.constant 0 : index
      %189 = vector.load %arg21[%c0_97, %c0_98] : memref<128x1xbf16, #tpu.memory_space<vmem>>, vector<128x1xbf16>
      %cst_99 = arith.constant dense<0.000000e+00> : vector<16x1xf32>
      %190 = tpu.matmul %188, %189, %cst_99 {dimension_numbers = #tpu.dot_dimension_numbers<[1], [0], [0], [1], [0, 0, 1, 1], [], []>} : vector<16x128xbf16>, vector<128x1xbf16>, vector<16x1xf32> -> vector<16x1xf32>
      %c0_100 = arith.constant 0 : index
      %c0_101 = arith.constant 0 : index
      %191 = vector.load %arg22[%c0_100, %c0_101] : memref<1x1xf32, #tpu.memory_space<vmem>>, vector<1x1xf32>
      %192 = vector.broadcast %191 : vector<1x1xf32> to vector<16x1xf32>
      %193 = arith.addf %190, %192 : vector<16x1xf32>
      %c0_102 = arith.constant 0 : index
      %c0_103 = arith.constant 0 : index
      %194 = vector.load %arg5[%c0_102, %c0_103] : memref<2x16xf32, #tpu.memory_space<vmem>>, vector<2x16xf32>
      %cst_104 = arith.constant dense<0.000000e+00> : vector<2x1xf32>
      %195 = tpu.matmul %194, %193, %cst_104 {dimension_numbers = #tpu.dot_dimension_numbers<[1], [0], [0], [1], [0, 0, 1, 1], [], []>} : vector<2x16xf32>, vector<16x1xf32>, vector<2x1xf32> -> vector<2x1xf32>
      %c0_105 = arith.constant 0 : index
      %c0_106 = arith.constant 0 : index
      %196 = vector.load %arg23[%c0_105, %c0_106] : memref<2x1xf32, #tpu.memory_space<vmem>>, vector<2x1xf32>
      tpu.vector_store %arg23[%c0_105, %c0_106], %195 {strides = array<i32>} : memref<2x1xf32, #tpu.memory_space<vmem>>, vector<2x1xf32>,
    } else {
    }
    return
  }
  func.func @transform_0(%arg0: i32) -> (i32, i32) {
    %c0_i32 = arith.constant 0 : i32
    %c0_i32_0 = arith.constant 0 : i32
    %c0_i32_1 = arith.constant 0 : i32
    return %c0_i32, %c0_i32_0 : i32, i32
  }
  func.func @transform_4(%arg0: i32) -> (i32, i32) {
    %c0_i32 = arith.constant 0 : i32
    %c0_i32_0 = arith.constant 0 : i32
    %c0_i32_1 = arith.constant 0 : i32
    return %c0_i32, %c0_i32_0 : i32, i32
  }
  func.func @transform_5(%arg0: i32) -> (i32, i32, i32) {
    %c0_i32 = arith.constant 0 : i32
    %c0_i32_0 = arith.constant 0 : i32
    %c0_i32_1 = arith.constant 0 : i32
    return %arg0, %c0_i32, %c0_i32_0 : i32, i32, i32
  }
  func.func @transform_6(%arg0: i32) -> (i32, i32, i32) {
    %c0_i32 = arith.constant 0 : i32
    %c0_i32_0 = arith.constant 0 : i32
    %c0_i32_1 = arith.constant 0 : i32
    return %arg0, %c0_i32, %c0_i32_0 : i32, i32, i32
  }
  func.func @transform_7(%arg0: i32) -> (i32, i32, i32) {
    %c0_i32 = arith.constant 0 : i32
    %c0_i32_0 = arith.constant 0 : i32
    %c0_i32_1 = arith.constant 0 : i32
    return %arg0, %c0_i32, %c0_i32_0 : i32, i32, i32
  }
  func.func @transform_8(%arg0: i32) -> (i32, i32, i32) {
    %c0_i32 = arith.constant 0 : i32
    %c0_i32_0 = arith.constant 0 : i32
    %c0_i32_1 = arith.constant 0 : i32
    return %arg0, %c0_i32, %c0_i32_0 : i32, i32, i32
  }
  func.func @transform_9(%arg0: i32) -> (i32, i32, i32) {
    %c0_i32 = arith.constant 0 : i32
    %c0_i32_0 = arith.constant 0 : i32
    %c0_i32_1 = arith.constant 0 : i32
    return %arg0, %c0_i32, %c0_i32_0 : i32, i32, i32
  }
  func.func @transform_10(%arg0: i32) -> (i32, i32, i32) {
    %c0_i32 = arith.constant 0 : i32
    %c0_i32_0 = arith.constant 0 : i32
    %c0_i32_1 = arith.constant 0 : i32
    return %arg0, %c0_i32, %c0_i32_0 : i32, i32, i32
  }
  func.func @transform_11(%arg0: i32) -> (i32, i32, i32) {
    %c0_i32 = arith.constant 0 : i32
    %c0_i32_0 = arith.constant 0 : i32
    %c0_i32_1 = arith.constant 0 : i32
    return %arg0, %c0_i32, %c0_i32_0 : i32, i32, i32
  }
  func.func @transform_12(%arg0: i32) -> (i32, i32, i32) {
    %c0_i32 = arith.constant 0 : i32
    %c0_i32_0 = arith.constant 0 : i32
    %c0_i32_1 = arith.constant 0 : i32
    return %arg0, %c0_i32, %c0_i32_0 : i32, i32, i32
  }
  func.func @transform_13(%arg0: i32) -> (i32, i32, i32) {
    %c0_i32 = arith.constant 0 : i32
    %c0_i32_0 = arith.constant 0 : i32
    %c0_i32_1 = arith.constant 0 : i32
    return %arg0, %c0_i32, %c0_i32_0 : i32, i32, i32
  }
  func.func @transform_14(%arg0: i32) -> (i32, i32, i32) {
    %c0_i32 = arith.constant 0 : i32
    %c0_i32_0 = arith.constant 0 : i32
    %c0_i32_1 = arith.constant 0 : i32
    return %arg0, %c0_i32, %c0_i32_0 : i32, i32, i32
  }
  func.func @transform_15(%arg0: i32) -> (i32, i32, i32) {
    %c0_i32 = arith.constant 0 : i32
    %c0_i32_0 = arith.constant 0 : i32
    %c0_i32_1 = arith.constant 0 : i32
    return %arg0, %c0_i32, %c0_i32_0 : i32, i32, i32
  }
  func.func @transform_16(%arg0: i32) -> (i32, i32, i32) {
    %c0_i32 = arith.constant 0 : i32
    %c0_i32_0 = arith.constant 0 : i32
    %c0_i32_1 = arith.constant 0 : i32
    return %arg0, %c0_i32, %c0_i32_0 : i32, i32, i32
  }
  func.func @transform_17(%arg0: i32) -> (i32, i32, i32) {
    %c0_i32 = arith.constant 0 : i32
    %c0_i32_0 = arith.constant 0 : i32
    %c0_i32_1 = arith.constant 0 : i32
    return %arg0, %c0_i32, %c0_i32_0 : i32, i32, i32
  }
  func.func @transform_18(%arg0: i32) -> (i32, i32) {
    %c0_i32 = arith.constant 0 : i32
    %c0_i32_0 = arith.constant 0 : i32
    %c0_i32_1 = arith.constant 0 : i32
    return %c0_i32, %c0_i32_0 : i32, i32
  }
  func.func @transform_19(%arg0: i32) -> (i32, i32) {
    %c0_i32 = arith.constant 0 : i32
    %c0_i32_0 = arith.constant 0 : i32
    %c0_i32_1 = arith.constant 0 : i32
    return %c0_i32, %c0_i32_0 : i32, i32
  }
  func.func @transform_20(%arg0: i32) -> (i32, i32) {
    %c0_i32 = arith.constant 0 : i32
    %c0_i32_0 = arith.constant 0 : i32
    %c0_i32_1 = arith.constant 0 : i32
    return %c0_i32, %c0_i32_0 : i32, i32
  }
  func.func @transform_21(%arg0: i32) -> (i32, i32) {
    %c0_i32 = arith.constant 0 : i32
    %c0_i32_0 = arith.constant 0 : i32
    %c0_i32_1 = arith.constant 0 : i32
    return %c0_i32, %c0_i32_0 : i32, i32
  }
  func.func @transform_22(%arg0: i32) -> (i32, i32) {
    %c0_i32 = arith.constant 0 : i32
    %c0_i32_0 = arith.constant 0 : i32
    %c0_i32_1 = arith.constant 0 : i32
    return %c0_i32, %c0_i32_0 : i32, i32
  }
}

</mosaic_0001>

<bundles_post_ra>
// kernel: painn_forward.1
= control target key start
LH: loop header
LB: loop body
LE: loop exit
PB: predicated region body
PF: predicated region fallthrough
CT: control target
= control target key end

     0   :  { %s4004_s29 = smov 0   ;;  %s4768_s0 = inlined_call_operand.vmem [shape: f32[16,128], index: 0, kind: input, shape index: {}]   ;;  %s4769_s1 = inlined_call_operand.vmem [shape: bf16[48,16], index: 1, kind: input, shape index: {}]   ;;  %s4770_s2 = inlined_call_operand.vmem [shape: bf16[16,48], index: 2, kind: input, shape index: {}]   ;;  %s4771_s3 = inlined_call_operand.vmem [shape: f32[48,24], index: 3, kind: input, shape index: {}]   ;;  %s4772_s4 = inlined_call_operand.vmem [shape: f32[2,16], index: 4, kind: input, shape index: {}]   ;;  %s4773_s5 = inlined_call_operand.vmem [shape: bf16[3,128,128], index: 5, kind: input, shape index: {}]   ;;  %s4774_s6 = inlined_call_operand.vmem [shape: f32[3,1,128], index: 6, kind: input, shape index: {}]   ;;  %s4775_s7 = inlined_call_operand.vmem [shape: bf16[3,128,384], index: 7, kind: input, shape index: {}]   ;;  %s4776_s8 = inlined_call_operand.vmem [shape: f32[3,1,384], index: 8, kind: input, shape index: {}]   ;;  %s4777_s9 = inlined_call_operand.vmem [shape: bf16[3,20,384], index: 9, kind: input, shape index: {}]   ;;  %s4778_s10 = inlined_call_operand.vmem [shape: f32[3,1,384], index: 10, kind: input, shape index: {}]   ;;  %s4779_s11 = inlined_call_operand.vmem [shape: bf16[3,128,256], index: 11, kind: input, shape index: {}]   ;;  %s4780_s12 = inlined_call_operand.vmem [shape: f32[3,1,256], index: 12, kind: input, shape index: {}]   ;;  %s4781_s13 = inlined_call_operand.vmem [shape: bf16[3,128,128], index: 13, kind: input, shape index: {}]   ;;  %s4782_s14 = inlined_call_operand.vmem [shape: bf16[3,128,128], index: 14, kind: input, shape index: {}]   ;;  %s4783_s15 = inlined_call_operand.vmem [shape: f32[3,1,128], index: 15, kind: input, shape index: {}]   ;;  %s4784_s16 = inlined_call_operand.vmem [shape: bf16[3,128,384], index: 16, kind: input, shape index: {}]   ;;  %s4785_s17 = inlined_call_operand.vmem [shape: f32[3,1,384], index: 17, kind: input, shape index: {}]   ;;  %s4786_s18 = inlined_call_operand.vmem [shape: bf16[128,128], index: 18, kind: input, shape index: {}]   ;;  %s4787_s19 = inlined_call_operand.vmem [shape: f32[1,128], index: 19, kind: input, shape index: {}]   ;;  %s4788_s20 = inlined_call_operand.vmem [shape: bf16[128,1], index: 20, kind: input, shape index: {}]   ;;  %s4789_s21 = inlined_call_operand.<no memory space> [shape: f32[1,1], index: 21, kind: input, shape index: {}]   ;;  %s4790_s22 = inlined_call_operand.vmem [shape: f32[2,1], index: 22, kind: output, shape index: {}]  }
   0x1   :  { %4800 = sst [smem:[#allocation20_spill]] %s4768_s0  ;;  %v27_v0 = vstv %s4789_s21 }
   0x2   :  { %4801 = sst [smem:[#allocation21_spill]] %s4769_s1  ;;  %28 = vst [vmem:[#allocation9] sm:$0x1] %v27_v0 }
   0x3   :  { %4802 = sst [smem:[#allocation22_spill]] %s4770_s2 }
   0x4   :  { %4803 = sst [smem:[#allocation23_spill]] %s4771_s3 }
   0x5   :  { %4804 = sst [smem:[#allocation24_spill]] %s4772_s4 }
   0x6   :  { %4805 = sst [smem:[#allocation25_spill]] %s4773_s5 }
   0x7   :  { %4806 = sst [smem:[#allocation26_spill]] %s4774_s6 }
   0x8   :  { %4807 = sst [smem:[#allocation27_spill]] %s4775_s7 }
   0x9   :  { %4808 = sst [smem:[#allocation28_spill]] %s4777_s9 }
   0xa   :  { %4809 = sst [smem:[#allocation29_spill]] %s4779_s11 }
   0xb   :  { %4810 = sst [smem:[#allocation30_spill]] %s4786_s18 }
   0xc   :  { %4811 = sst [smem:[#allocation31_spill]] %s4787_s19 }
   0xd   :  { %4812 = sst [smem:[#allocation32_spill]] %s4788_s20 }
   0xe   :  { %4813 = sst [smem:[#allocation33_spill]] %s4790_s22 }
   0xf LB: > { %4814 = sst [smem:[#allocation16_spill]] %s3879_s29  ;;  %s4010_s30 = sadd.s32 4294967295, %s3879_s29   ;;  %s3879_s29 = sphi %s4004_s29, %s34_s29  }
  0x10   : > { %4815 = sst [smem:[#allocation17_spill]] %s4010_s30  ;;  %p3122_p0 = scmp.ge.s32.totalorder %s3879_s29, 1 }
  0x11   : > { %p649_p1 = scmp.lt.s32.totalorder %s3879_s29, 4 }
  0x13   : > { %p650_p2 = pnand %p3122_p0, %p649_p1 }
  0x15   : > { %653 = sbr.rel (%p650_p2) target bundleno = 1816 (0x718), region = 96 }
  0x1a   : > { %p752_p3 = scmp.lt.s32.totalorder %s4010_s30, 2  ;;  %s4817_s25 = sld [smem:[#allocation25_spill]] }
  0x1b   : > { %s4819_s7 = sld [smem:[#allocation27_spill]] }
  0x1c   : > { %s4016_s21 = scalar_select %p752_p3, %s4010_s30, 2 }
  0x1d   : > { %s4821_s9 = sld [smem:[#allocation28_spill]] }
  0x1e   : > { %s3672_s4 = sshll.u32 %s4016_s21, 6  ;;  %s3803_s2 = smul.u32 192, %s4016_s21 }
  0x1f   : > { %s4030_s27 = smul.u32 3, %s4016_s21  ;;  %s3673_s3 = sshll.u32 %s4016_s21, 7 }
  0x20   : > { %s4026_s26 = scalar_lea.vmem %s4817_s25, %s3672_s4  ;;  %s3805_s0 = smul.u32 36, %s4016_s21 }
  0x21   : > { %4818 = sst [smem:[#allocation18_spill]] %s4026_s26  ;;  %s4036_s22 = scalar_lea.vmem %s4819_s7, %s3803_s2 }
  0x22   : > { %4820 = sst [smem:[#allocation19_spill]] %s4036_s22  ;;  %s3129_s28 = sshll.u32 %s4016_s21, 1 }
  0x23   : > { %s4050_s18 = scalar_lea.vmem %s4821_s9, %s3805_s0  ;;  %s4822_s11 = sld [smem:[#allocation29_spill]] }
  0x24   : > { %s4061_s23 = scalar_lea.vmem %s4781_s13, %s3672_s4  ;;  %s4066_s24 = scalar_lea.vmem %s4780_s12, %s3129_s28 }
  0x25   : > { %s4071_s20 = scalar_lea.vmem %s4782_s14, %s3672_s4  ;;  %s799_s26 = scalar_lea.vmem %s4783_s15, %s4016_s21 }
  0x26   : > { %s4080_s7 = scalar_lea.vmem %s4784_s16, %s3803_s2  ;;  %s4823_s28 = sld [smem:[#allocation17_spill]] }
  0x29   : > { %s4055_s29 = scalar_lea.vmem %s4822_s11, %s3673_s3 }
  0x2c   : > { %p3135_p4 = scmp.ne.s32.totalorder %s4823_s28, 0 }
  0x2d   : > { %s4824_s4 = sld [smem:[#allocation20_spill]] (!%p3135_p4) }
  0x2e   : > { %813 = sbr.rel (%p3135_p4) target bundleno = 91 (0x5b), region = 100  ;;  %s4825_s25 = sld [smem:[#allocation21_spill]] (!%p3135_p4) }
  0x33   : > { %v814_v1 = vld [vmem:[%s4824_s4] sm:$0xff]  ;;  %v815_v2 = vld [vmem:[%s4824_s4 + $0x8] sm:$0xff]  ;;  %v3881_v3 = vmov 0.0  }
  0x34   : > { %816 = vst [vmem:[#allocation2] sm:$0xff] %v814_v1  ;;  %v840_v4 = vld [vmem:[%s4825_s25] sm:$0xff]  ;;  %v842_v5 = vld [vmem:[%s4825_s25 + $0x8] sm:$0xff]  ;;  %v844_v6 = vld [vmem:[%s4825_s25 + $0x10] sm:$0xff] }
  0x35   : > { %817 = vst [vmem:[#allocation2 + $0x8] sm:$0xff] %v815_v2 }
  0x36   : > { %821 = vst [vmem:[#allocation3 + $0x48] sm:$0xff] %v3881_v3 }
  0x37   : > { %822 = vst [vmem:[#allocation3 + $0x18] sm:$0xff] %v3881_v3 }
  0x38   : > { %823 = vst [vmem:[#allocation3] sm:$0xff] %v3881_v3 }
  0x39   : > { %827 = vst [vmem:[#allocation3 + $0x8] sm:$0xff] %v3881_v3 }
  0x3a   : > { %828 = vst [vmem:[#allocation3 + $0x58] sm:$0xff] %v3881_v3 }
  0x3b   : > { %829 = vst [vmem:[#allocation3 + $0x38] sm:$0xff] %v3881_v3 }
  0x3c   : > { %841 = vst [vmem:[#allocation4] sm:$0xff] %v840_v4 }
  0x3d   : > { %843 = vst [vmem:[#allocation4 + $0x8] sm:$0xff] %v842_v5 }
  0x3e   : > { %845 = vst [vmem:[#allocation4 + $0x10] sm:$0xff] %v844_v6 }
  0x3f   : > { %851 = vsyncadd [#allocation8], 384  ;;  %s4826_s1 = sld [smem:[#allocation22_spill]] }
  0x45   : > { %v879_v7 = vld [vmem:[%s4826_s1] sm:$0xff] }
  0x46   : > { %880 = vst [vmem:[#allocation5] sm:$0xff] %v879_v7 }
  0x47   : > { %886 = vsyncadd [#allocation8 + $0x1], 128  ;;  %s4827_s9 = sld [smem:[#allocation23_spill]] }
  0x4d   : > { %v898_v8 = vld [vmem:[%s4827_s9] sm:$0xff]  ;;  %v900_v9 = vld [vmem:[%s4827_s9 + $0x8] sm:$0xff]  ;;  %v902_v10 = vld [vmem:[%s4827_s9 + $0x10] sm:$0xff] }
  0x4e   : > { %899 = vst [vmem:[#allocation6 + $0x28] sm:$0xff] %v898_v8  ;;  %v904_v11 = vld [vmem:[%s4827_s9 + $0x18] sm:$0xff]  ;;  %v906_v12 = vld [vmem:[%s4827_s9 + $0x20] sm:$0xff]  ;;  %v908_v13 = vld [vmem:[%s4827_s9 + $0x28] sm:$0xff] }
  0x4f   : > { %901 = vst [vmem:[#allocation6 + $0x20] sm:$0xff] %v900_v9 }
  0x50   : > { %903 = vst [vmem:[#allocation6 + $0x18] sm:$0xff] %v902_v10 }
  0x51   : > { %905 = vst [vmem:[#allocation6 + $0x10] sm:$0xff] %v904_v11 }
  0x52   : > { %907 = vst [vmem:[#allocation6 + $0x8] sm:$0xff] %v906_v12 }
  0x53   : > { %909 = vst [vmem:[#allocation6] sm:$0xff] %v908_v13 }
  0x54   : > { %915 = vsyncadd [#allocation8 + $0x2], 768 }
  0x55   : > { %3871 = dma.done.wait [#allocation8], 384 }
  0x56   : > { %3872 = vsyncadd [#allocation8], 4294966912 }
  0x57   : > { %3873 = dma.done.wait [#allocation8 + $0x1], 128 }
  0x58   : > { %3874 = vsyncadd [#allocation8 + $0x1], 4294967168 }
  0x59   : > { %3875 = dma.done.wait [#allocation8 + $0x2], 768 }
  0x5a   : > { %3876 = vsyncadd [#allocation8 + $0x2], 4294966528 }
  0x5b PF: > { %v942_v14 = vld [vmem:[%s4050_s18 + $0x18] sm:$0x33]  ;;  %s4828_s5 = sld [smem:[#allocation18_spill]]  ;;  %vm1034_vm0 = vcmask 1041408   ;;  %v3882_v17 = vmov 20   ;;  %v4130_v23 = vld [vmem:[#allocation6] sm:$0xff]  ;;  %s4832_s22 = scalar_lea.vmem %s4776_s8, %s4030_s27 }
  0x5c   : > { %v1013_v15 = vunpack.c.h.b16 %v942_v14  ;;  %v4124_v16 = vld [vmem:[#allocation6 + $0x8] sm:$0xff]  ;;  %3819 = vset.pattern.permute.xlu0 %v3882_v17  ;;  %3820 = vset.pattern.permute.xlu1 %v3882_v17  ;;  %v3676_v19 = vld [vmem:[%s4050_s18 + $0x4] sm:$0xf]  ;;  %v3140_v20 = vld [vmem:[%s4050_s18 + $0xc] sm:$0xf0]  ;;  %vm1024_vm1 = vcmask 162816   ;;  %v1012_v26 = vunpack.c.l.b16 %v942_v14  ;;  %s4833_s6 = scalar_lea.vmem %s4778_s10, %s4030_s27 }
  0x5d   : > { %974 = vperm.xlu0 %3819, %v4124_v16   ;;  %3821 = vset.pattern.permute.xlu2 %v3882_v17  ;;  %v3143_v22 = vor.u32 %v3676_v19, %v3140_v20  ;;  %v4135_v25 = vpack.c.bf16 %v4130_v23, %v4124_v16  ;;  %v927_v36 = vld [vmem:[#allocation2] sm:$0xff]  ;;  %v928_v37 = vld [vmem:[#allocation2 + $0x8] sm:$0xff]  ;;  %v4153_v44 = vld [vmem:[#allocation6 + $0x28] sm:$0xff]  ;;  %s4829_s19 = sld [smem:[#allocation19_spill]]  ;;  %vm1495_vm10 = vcmask 130048   ;;  %vm1920_vm11 = vcmask 392192  }
  0x5e   : > { %v1019_v18 = vpack.c.b16 %v1013_v15, %v1013_v15  ;;  %v1018_v28 = vpack.c.b16 %v1012_v26, %v1012_v26  ;;  %v1116_v38 = vpack.c.bf16 %v928_v37, %v927_v36  ;;  %v3138_v39 = vld [vmem:[%s4050_s18] sm:$0xf]  ;;  %v3677_v40 = vld [vmem:[%s4050_s18 + $0x8] sm:$0xf0]  ;;  %v4155_v45 = vld [vmem:[#allocation6 + $0x20] sm:$0xff]  ;;  %954 = vperm.xlu2 %3821, %v4153_v44   ;;  %s4830_s0 = sld [smem:[#allocation26_spill]] }
  0x5f   : > { %v3139_v41 = vor.u32 %v3677_v40, %v3138_v39  ;;  %v943_v42 = vld [vmem:[%s4050_s18 + $0x20] sm:$0x3]  ;;  %v935_v46 = vpack.c.bf16 %v4155_v45, %v4153_v44  ;;  %v3146_v48 = vld [vmem:[%s4050_s18 + $0x8] sm:$0xf]  ;;  %v3678_v49 = vld [vmem:[%s4050_s18 + $0x10] sm:$0xf0] }
  0x60   : > { %v1039_v21 = vsel %vm1034_vm0, %v1019_v18, 0  ;;  %v1036_v29 = vsel %vm1034_vm0, %v1018_v28, 0  ;;  %v1014_v43 = vunpack.c.l.b16 %v943_v42  ;;  %v3147_v51 = vor.u32 %v3678_v49, %v3146_v48  ;;  %v4167_v52 = vld [vmem:[#allocation6 + $0x18] sm:$0xff]  ;;  %v4169_v53 = vld [vmem:[#allocation6 + $0x10] sm:$0xff] }
  0x61   : > { %3801 = vmatpush.bf16.msra.mxu3 %v1039_v21  ;;  %1074 = vmatpush.bf16.msra.mxu1 %v1039_v21  ;;  %v3686_v24 = vld [vmem:[%s4828_s5 + $0x38] sm:$0xff]  ;;  %v3685_v27 = vld [vmem:[%s4828_s5 + $0x30] sm:$0xff]  ;;  %v3684_v30 = vld [vmem:[%s4828_s5 + $0x28] sm:$0xff]  ;;  %v936_v54 = vpack.c.bf16 %v4169_v53, %v4167_v52 }
  0x62   : > { %3799 = vmatpush.bf16.msra.mxu2 %v1036_v29  ;;  %1050 = vmatpush.bf16.msra.mxu0 %v1036_v29  ;;  %v3683_v31 = vld [vmem:[%s4828_s5 + $0x20] sm:$0xff]  ;;  %v3682_v32 = vld [vmem:[%s4828_s5 + $0x18] sm:$0xff]  ;;  %v3681_v33 = vld [vmem:[%s4828_s5 + $0x10] sm:$0xff]  ;;  %v1020_v47 = vpack.c.b16 %v1014_v43, %v1014_v43 }
  0x63   : > { %v3680_v34 = vld [vmem:[%s4828_s5 + $0x8] sm:$0xff]  ;;  %v3679_v35 = vld [vmem:[%s4828_s5] sm:$0xff]  ;;  %v3709_v56 = vld [vmem:[%s4829_s19 + $0xb0] sm:$0xf0]  ;;  %964 = vperm.xlu1 %3820, %v4167_v52  }
  0x64   : > { %v1042_v50 = vsel %vm1034_vm0, %v1020_v47, 0  ;;  %v3277_v55 = vld [vmem:[%s4829_s19 + $0xa8] sm:$0xf]  ;;  %v3708_v57 = vld [vmem:[%s4829_s19 + $0xac] sm:$0xf]  ;;  %s4831_s30 = scalar_lea.vmem %s4830_s0, %s4016_s21 }
  0x65   : > { %3802 = vmatpush.bf16.msra.mxu3 %v3143_v22  ;;  %1075 = vmatpush.bf16.msra.mxu1 %v3143_v22  ;;  %v3278_v58 = vor.u32 %v3709_v56, %v3277_v55  ;;  %v3279_v59 = vld [vmem:[%s4829_s19 + $0xb4] sm:$0xf0]  ;;  %v3285_v60 = vld [vmem:[%s4829_s19 + $0xb0] sm:$0xf]  ;;  %v3710_v61 = vld [vmem:[%s4829_s19 + $0xb8] sm:$0xf0] }
  0x66   : > { %979 = vperm.xlu0 %3819, %v4130_v23   ;;  %3800 = vmatpush.bf16.msra.mxu2 %v3139_v41  ;;  %v3282_v62 = vor.u32 %v3708_v57, %v3279_v59  ;;  %v3286_v63 = vor.u32 %v3710_v61, %v3285_v60  ;;  %v3265_v0 = vld [vmem:[%s4829_s19 + $0x90] sm:$0xf]  ;;  %v3706_v1 = vld [vmem:[%s4829_s19 + $0x98] sm:$0xf0]  ;;  %v3705_v2 = vld [vmem:[%s4829_s19 + $0x94] sm:$0xf] }
  0x67   : > { %1051 = vmatpush.bf16.msra.mxu0 %v3139_v41  ;;  %959 = vperm.xlu2 %3821, %v4155_v45   ;;  %v3266_v4 = vor.u32 %v3706_v1, %v3265_v0  ;;  %v3267_v5 = vld [vmem:[%s4829_s19 + $0x9c] sm:$0xf0]  ;;  %v3273_v6 = vld [vmem:[%s4829_s19 + $0x98] sm:$0xf]  ;;  %v3707_v7 = vld [vmem:[%s4829_s19 + $0xa0] sm:$0xf0] }
  0x68   : > { %3153 = vmatmul.msk.bf16.vlgmr.msra.gmra.mxu3 %vm1024_vm1, %v4135_v25  ;;  %3151 = vmatmul.msk.bf16.vlgmr.msra.gmra.mxu1 %vm1024_vm1, %v935_v46  ;;  %v3270_v8 = vor.u32 %v3705_v2, %v3267_v5  ;;  %v3274_v9 = vor.u32 %v3707_v7, %v3273_v6  ;;  %v3253_v10 = vld [vmem:[%s4829_s19 + $0x78] sm:$0xf]  ;;  %v3703_v11 = vld [vmem:[%s4829_s19 + $0x80] sm:$0xf0]  ;;  %v3702_v12 = vld [vmem:[%s4829_s19 + $0x7c] sm:$0xf] }
  0x69   : > { %1185 = vmatpush.bf16.msrb.mxu3 %v3686_v24  ;;  %3150 = vmatmul.msk.bf16.vlgmr.msra.gmra.mxu2 %vm1024_vm1, %v4135_v25  ;;  %v3254_v13 = vor.u32 %v3703_v11, %v3253_v10  ;;  %v3255_v14 = vld [vmem:[%s4829_s19 + $0x84] sm:$0xf0]  ;;  %v3261_v15 = vld [vmem:[%s4829_s19 + $0x80] sm:$0xf]  ;;  %v3704_v17 = vld [vmem:[%s4829_s19 + $0x88] sm:$0xf0] }
  0x6a   : > { %3148 = vmatmul.msk.bf16.vlgmr.msra.gmra.mxu0 %vm1024_vm1, %v935_v46  ;;  %1098 = vmatpush.bf16.msrb.mxu2 %v1042_v50  ;;  %v3258_v18 = vor.u32 %v3702_v12, %v3255_v14  ;;  %v3262_v19 = vor.u32 %v3704_v17, %v3261_v15  ;;  %v3241_v20 = vld [vmem:[%s4829_s19 + $0x60] sm:$0xf]  ;;  %v3700_v21 = vld [vmem:[%s4829_s19 + $0x68] sm:$0xf0]  ;;  %v3699_v22 = vld [vmem:[%s4829_s19 + $0x64] sm:$0xf] }
  0x6b   : > { %1408 = vmatpush.bf16.msrb.mxu0 %v3278_v58  ;;  %1422 = vmatpush.bf16.msrb.mxu1 %v3282_v62  ;;  %v3242_v24 = vor.u32 %v3700_v21, %v3241_v20  ;;  %v3243_v26 = vld [vmem:[%s4829_s19 + $0x6c] sm:$0xf0]  ;;  %v3701_v28 = vld [vmem:[%s4829_s19 + $0x70] sm:$0xf0]  ;;  %v3231_v36 = vld [vmem:[%s4829_s19 + $0x54] sm:$0xf0] }
  0x6c   : > { %969 = vperm.xlu1 %3820, %v4169_v53   ;;  %v3246_v29 = vor.u32 %v3699_v22, %v3243_v26  ;;  %v3237_v37 = vld [vmem:[%s4829_s19 + $0x50] sm:$0xf]  ;;  %v3833_v41 = vld [vmem:[%s4831_s30] ss:$0 sm:$0xff]  ;;  %v3694_v43 = vld [vmem:[%s4829_s19 + $0x38] sm:$0xf0] }
  0x6d   : > { %1186 = vmatpush.bf16.msrb.mxu3 %v3685_v27  ;;  %v3249_v27 = vld [vmem:[%s4829_s19 + $0x68] sm:$0xf]  ;;  %v3217_v42 = vld [vmem:[%s4829_s19 + $0x30] sm:$0xf]  ;;  %v3225_v48 = vld [vmem:[%s4829_s19 + $0x38] sm:$0xf] }
  0x6e   : > { %1099 = vmatpush.bf16.msrb.mxu2 %v3147_v51  ;;  %v3218_v47 = vor.u32 %v3694_v43, %v3217_v42  ;;  %v3695_v49 = vld [vmem:[%s4829_s19 + $0x40] sm:$0xf0]  ;;  %v3205_v56 = vld [vmem:[%s4829_s19 + $0x18] sm:$0xf]  ;;  %v3690_v58 = vld [vmem:[%s4829_s19 + $0x1c] sm:$0xf] }
  0x6f   : > { %1409 = vmatpush.bf16.msrb.mxu0 %v3266_v4  ;;  %1423 = vmatpush.bf16.msrb.mxu1 %v3270_v8  ;;  %v3226_v51 = vor.u32 %v3695_v49, %v3225_v48  ;;  %v3691_v57 = vld [vmem:[%s4829_s19 + $0x20] sm:$0xf0]  ;;  %v3207_v60 = vld [vmem:[%s4829_s19 + $0x24] sm:$0xf0]  ;;  %v3213_v61 = vld [vmem:[%s4829_s19 + $0x20] sm:$0xf] }
  0x70   : > { %v3206_v59 = vor.u32 %v3691_v57, %v3205_v56  ;;  %v3692_v62 = vld [vmem:[%s4829_s19 + $0x28] sm:$0xf0]  ;;  %v3210_v0 = vor.u32 %v3690_v58, %v3207_v60  ;;  %v3193_v2 = vld [vmem:[%s4829_s19] sm:$0xf]  ;;  %v3687_v5 = vld [vmem:[%s4829_s19 + $0x4] sm:$0xf] }
  0x71   : > { %1187 = vmatpush.bf16.msrb.mxu3 %v3684_v30  ;;  %v3250_v30 = vor.u32 %v3701_v28, %v3249_v27  ;;  %v3214_v1 = vor.u32 %v3692_v62, %v3213_v61  ;;  %v3688_v4 = vld [vmem:[%s4829_s19 + $0x8] sm:$0xf0]  ;;  %v3195_v7 = vld [vmem:[%s4829_s19 + $0xc] sm:$0xf0]  ;;  %v3201_v8 = vld [vmem:[%s4829_s19 + $0x8] sm:$0xf] }
  0x72   : > { %1436 = vmatpush.bf16.msra.mxu2 %v3286_v63  ;;  %v3194_v6 = vor.u32 %v3688_v4, %v3193_v2  ;;  %v3198_v10 = vor.u32 %v3687_v5, %v3195_v7  ;;  %v3883_v48 = vmov 21   ;;  %v3884_v60 = vmov 22   ;;  %v4270_v62 = vld [vmem:[#allocation3 + $0x48] sm:$0xff]  ;;  %v4279_v2 = vld [vmem:[#allocation4] sm:$0xff]  ;;  %v1272_v7 = vld [vmem:[%s4832_s22] sm:$0x7] }
  0x73   : > { %1410 = vmatpush.bf16.msrb.mxu0 %v3254_v13  ;;  %1424 = vmatpush.bf16.msrb.mxu1 %v3258_v18 }
  0x74   : > { %3823 = vset.pattern.permute.xlu1 %v3883_v48  ;;  %3824 = vset.pattern.permute.xlu2 %v3883_v48 }
  0x75   : > { %1188 = vmatpush.bf16.msrb.mxu3 %v3683_v31  ;;  %1706 = vperm.xlu1 %3823, %v4130_v23  }
  0x76   : > { %1437 = vmatpush.bf16.msra.mxu2 %v3274_v9  ;;  %v3689_v9 = vld [vmem:[%s4829_s19 + $0x10] sm:$0xf0]  ;;  %1694 = vperm.xlu2 %3824, %v4167_v52  }
  0x77   : > { %1411 = vmatpush.bf16.msrb.mxu0 %v3242_v24  ;;  %1425 = vmatpush.bf16.msrb.mxu1 %v3246_v29  ;;  %v3202_v11 = vor.u32 %v3689_v9, %v3201_v8  ;;  %v3885_v8 = vmov 23  }
  0x78   : > { %3152 = vmatmul.msk.bf16.gmra.mxu1 %vm1024_vm1, %v936_v54  ;;  %3822 = vset.pattern.permute.xlu0 %v3883_v48 }
  0x79   : > { %1189 = vmatpush.bf16.msrb.mxu3 %v3682_v32  ;;  %3154 = vmatmul.msk.bf16.vlgmr.msrb.gmra.mxu2 %vm1024_vm1, %v935_v46  ;;  %v3229_v32 = vld [vmem:[%s4829_s19 + $0x48] sm:$0xf]  ;;  %v3693_v46 = vld [vmem:[%s4829_s19 + $0x34] sm:$0xf] }
  0x7a   : > { %3149 = vmatmul.msk.bf16.gmra.mxu0 %vm1024_vm1, %v936_v54  ;;  %1438 = vmatpush.bf16.msra.mxu2 %v3262_v19 }
  0x7b   : > { %1702 = vperm.xlu0 %3822, %v4124_v16  }
  0x7d   : > { %1190 = vmatpush.bf16.msrb.mxu3 %v3681_v33  ;;  %v3697_v33 = vld [vmem:[%s4829_s19 + $0x50] sm:$0xf0]  ;;  %1698 = vperm.xlu1 %3823, %v4169_v53  }
  0x7e   : > { %1439 = vmatpush.bf16.msra.mxu2 %v3250_v30  ;;  %3825 = vset.pattern.permute.xlu2 %v3884_v60 }
  0x7f   : > { %1756 = vperm.xlu2 %3825, %v4124_v16  }
  0x81   : > { %1191 = vmatpush.bf16.msrb.mxu3 %v3680_v34  ;;  %v3696_v34 = vld [vmem:[%s4829_s19 + $0x4c] sm:$0xf] }
  0x82   : > { %v3234_v39 = vor.u32 %v3696_v34, %v3231_v36 }
  0x83   : > { %3826 = vset.pattern.permute.xlu0 %v3884_v60 }
  0x84   : > { %1426 = vmatpush.bf16.msrb.mxu1 %v3234_v39  ;;  %1760 = vperm.xlu0 %3826, %v4130_v23  }
  0x85   : > { %1192 = vmatpush.bf16.msrb.mxu3 %v3679_v35  ;;  %v3230_v35 = vor.u32 %v3697_v33, %v3229_v32  ;;  %1686 = vperm.xlu1 %3823, %v4153_v44  }
  0x87   : > { %1412 = vmatpush.bf16.msrb.mxu0 %v3230_v35  ;;  %3827 = vset.pattern.permute.xlu2 %v3883_v48 }
  0x88   : > { %1193 = vmatmul.bf16.vlgmr.msrb.gmra.mxu3 %v1116_v38  ;;  %v3698_v38 = vld [vmem:[%s4829_s19 + $0x58] sm:$0xf0]  ;;  %1690 = vperm.xlu2 %3827, %v4155_v45  }
  0x89   : > { %3155 = vmatmul.msk.bf16.gmra.mxu2 %vm1024_vm1, %v936_v54  ;;  %v3238_v40 = vor.u32 %v3698_v38, %v3237_v37 }
  0x8b   : > { %1440 = vmatpush.bf16.msra.mxu2 %v3238_v40  ;;  %1413 = vmatpush.bf16.msrb.mxu0 %v3218_v47 }
  0x8c   : > { %1740 = vperm.xlu0 %3826, %v4153_v44  }
  0x8d   : > { %3828 = vset.pattern.permute.xlu1 %v3884_v60 }
  0x8e   : > { %1748 = vperm.xlu1 %3828, %v4167_v52  }
  0x8f   : > { %1441 = vmatpush.bf16.msra.mxu2 %v3226_v51  ;;  %1414 = vmatpush.bf16.msrb.mxu0 %v3206_v59 }
  0x90   : > { %3829 = vset.pattern.permute.xlu2 %v3884_v60 }
  0x91   : > { %1752 = vperm.xlu2 %3829, %v4169_v53  }
  0x93   : > { %1442 = vmatpush.bf16.msra.mxu2 %v3214_v1  ;;  %1415 = vmatpush.bf16.msrb.mxu0 %v3194_v6 }
  0x94   : > { %3831 = vset.pattern.permute.xlu0 %v3885_v8 }
  0x95   : > { %1814 = vperm.xlu0 %3831, %v4130_v23  }
  0x96   : > { %1744 = vperm.xlu1 %3828, %v4155_v45  }
  0x97   : > { %1443 = vmatpush.bf16.msra.mxu2 %v3202_v11  ;;  %v1275_v11 = vperm.slane %v1272_v7, 1 }
  0x99   : > { %3156 = vmatmul.msk.bf16.gmra.mxu2 %vm1024_vm1, %v4135_v25  ;;  %v3219_v25 = vld [vmem:[%s4829_s19 + $0x3c] sm:$0xf0]  ;;  %3830 = vset.pattern.permute.xlu2 %v3885_v8 }
  0x9a   : > { %v3222_v50 = vor.u32 %v3693_v46, %v3219_v25  ;;  %1810 = vperm.xlu2 %3830, %v4124_v16  }
  0x9c   : > { %1427 = vmatpush.bf16.msrb.mxu1 %v3222_v50 }
  0x9e   : > { %3832 = vset.pattern.permute.xlu1 %v3885_v8 }
  0x9f   : > { %1802 = vperm.xlu1 %3832, %v4167_v52   ;;  %v4304_v52 = vld [vmem:[#allocation3 + $0x18] sm:$0xff] }
  0xa0   : > { %1428 = vmatpush.bf16.msrb.mxu1 %v3210_v0 }
  0xa2   : > { %1806 = vperm.xlu2 %3830, %v4169_v53  }
  0xa4   : > { %1429 = vmatpush.bf16.msrb.mxu1 %v3198_v10  ;;  %v1274_v10 = vperm.slane %v1272_v7, 0 }
  0xa7   : > { %1794 = vperm.xlu1 %3832, %v4153_v44  }
  0xaa   : > { %1798 = vperm.xlu2 %3830, %v4155_v45  }
  0xb8   : > { %v955_v53 = vpop.permute.xlu2 %954 }
  0xd5   : > { %v965_v45 = vpop.permute.xlu1 %964 }
  0xeb   : > { %v4186_v3 = vpop.f32.mrf.mxu3 }
  0xec   : > { %v4241_v25 = vpop.f32.mrf.mxu2 }
  0xf3   : > { %v4204_v31 = vpop.f32.mrf.mxu3 }
  0xf4   : > { %v4246_v49 = vpop.f32.mrf.mxu2 }
  0xfc   : > { %v4250_v50 = vpop.f32.mrf.mxu2 }
 0x104   : > { %v4252_v51 = vpop.f32.mrf.mxu2 }
 0x10b   : > { %v1194_v54 = vpop.f32.mrf.mxu3 }
 0x10c   : > { %v4225_v55 = vadd.f32 %v3833_v41, %v1194_v54  ;;  %v4254_v54 = vpop.f32.mrf.mxu1  ;;  %v4258_v56 = vpop.f32.mrf.mxu2 }
 0x10e   : > { %v3189_v63 = vmul.f32 -1.442695, %v4225_v55 }
 0x110   : > { %3835 = vpow2.f32 %v3189_v63  ;;  %v4272_v63 = vld [vmem:[#allocation3 + $0x8] sm:$0xff] }
 0x111   : > { %v1477_v1 = vpack.c.bf16 %v4272_v63, %v4270_v62 }
 0x113   : > { %v1196_v12 = vpop.f32.mrf.mxu3  ;;  %1584 = vmatpush.bf16.msrb.mxu2 %v1477_v1 }
 0x114   : > { %v1197_v13 = vadd.f32 %v3833_v41, %v1196_v12  ;;  %v4260_v57 = vpop.f32.mrf.mxu1  ;;  %v4264_v59 = vpop.f32.mrf.mxu2 }
 0x116   : > { %v3836_v14 = vpop.eup %3835  ;;  %v3190_v15 = vmul.f32 -1.442695, %v1197_v13 }
 0x117   : > { %v1205_v17 = vadd.f32 1.0, %v3836_v14 }
 0x118   : > { %3837 = vpow2.f32 %v3190_v15 }
 0x119   : > { %3839 = vrcp.f32 %v1205_v17  ;;  %v1218_v29 = vand.u32 2147483648, %v1205_v17  ;;  %vm1212_vm3 = vweird.f32 %v1205_v17  ;;  %v1216_v30 = vand.u32 2147483647, %v1205_v17 }
 0x11b   : > { %v1219_v37 = vor.u32 1.1754944e-38, %v1218_v29  ;;  %vm1217_vm6 = vcmp.eq.f32.partialorder %v1216_v30, 8.507059e+37 }
 0x11c   : > { %v4268_v61 = vpop.f32.mrf.mxu1  ;;  %v4281_v4 = vpop.f32.mrf.mxu2 }
 0x11e   : > { %v3838_v18 = vpop.eup %3837 }
 0x11f   : > { %v3840_v19 = vpop.eup %3839  ;;  %v1206_v20 = vadd.f32 1.0, %v3838_v18  ;;  %v1276_v18 = vperm.slane %v1272_v7, 2 }
 0x120   : > { %v1208_v21 = vmul.f32 %v3840_v19, %v1205_v17  ;;  %vm1213_vm2 = vweird.f32 %v3840_v19  ;;  %v3712_v17 = vld [vmem:[#allocation4 + $0x8] sm:$0xff] }
 0x121   : > { %3841 = vrcp.f32 %v1206_v20  ;;  %vm1214_vm4 = vmor %vm1212_vm3, %vm1213_vm2  ;;  %v1233_v33 = vand.u32 2147483648, %v1206_v20  ;;  %v1231_v36 = vand.u32 2147483647, %v1206_v20  ;;  %vm1227_vm7 = vweird.f32 %v1206_v20 }
 0x122   : > { %v1209_v22 = vsub.f32 1.0, %v1208_v21  ;;  %v4308_v21 = vld [vmem:[#allocation3] sm:$0xff] }
 0x123   : > { %v1234_v40 = vor.u32 1.1754944e-38, %v1233_v33  ;;  %vm1232_vm9 = vcmp.eq.f32.partialorder %v1231_v36, 8.507059e+37  ;;  %v4340_v36 = vpop.permute.xlu1 %969 }
 0x124   : > { %v1210_v24 = vmul.f32 %v3840_v19, %v1209_v22  ;;  %v4288_v5 = vpop.f32.mrf.mxu1  ;;  %v4298_v9 = vpop.f32.mrf.mxu2  ;;  %v4310_v22 = vld [vmem:[#allocation3 + $0x38] sm:$0xff] }
 0x125   : > { %v1479_v29 = vpack.c.bf16 %v4310_v22, %v4308_v21 }
 0x126   : > { %v1211_v27 = vadd.f32 %v3840_v19, %v1210_v24 }
 0x127   : > { %v3842_v26 = vpop.eup %3841 }
 0x128   : > { %v1223_v28 = vmul.f32 %v3842_v26, %v1206_v20  ;;  %v1215_v34 = vsel %vm1214_vm4, %v3840_v19, %v1211_v27  ;;  %vm1228_vm5 = vweird.f32 %v3842_v26  ;;  %v4306_v20 = vld [vmem:[#allocation3 + $0x58] sm:$0xff] }
 0x129   : > { %v1220_v39 = vsel %vm1217_vm6, %v1219_v37, %v1215_v34  ;;  %vm1229_vm8 = vmor %vm1227_vm7, %vm1228_vm5  ;;  %v1478_v44 = vpack.c.bf16 %v4306_v20, %v4304_v52  ;;  %v3713_v34 = vld [vmem:[#allocation4 + $0x10] sm:$0xff] }
 0x12a   : > { %v1224_v32 = vsub.f32 1.0, %v1223_v28  ;;  %v1237_v43 = vmul.f32 %v1220_v39, %v4225_v55  ;;  %v4256_v55 = vpop.f32.mrf.mxu0  ;;  %v944_v39 = vld [vmem:[%s4833_s6] sm:$0x7] }
 0x12b   : > { %v4342_v37 = vpop.permute.xlu1 %1706  ;;  %v4358_v48 = vperm.slane %v944_v39, 2 }
 0x12c   : > { %v1225_v35 = vmul.f32 %v3842_v26, %v1224_v32 }
 0x12d   : > { %v984_v8 = vmul.f32 %v955_v53, %v4358_v48 }
 0x12e   : > { %v1226_v38 = vadd.f32 %v3842_v26, %v1225_v35 }
 0x130   : > { %v1230_v41 = vsel %vm1229_vm8, %v3842_v26, %v1226_v38  ;;  %v960_v38 = vpop.permute.xlu2 %959 }
 0x131   : > { %v1235_v42 = vsel %vm1232_vm9, %v1234_v40, %v1230_v41  ;;  %v4349_v40 = vperm.slane %v944_v39, 1 }
 0x132   : > { %v1238_v46 = vmul.f32 %v1235_v42, %v1197_v13  ;;  %v4262_v58 = vpop.f32.mrf.mxu0 }
 0x133   : > { %v983_v42 = vmul.f32 %v955_v53, %v4349_v40 }
 0x134   : > { %v1239_v47 = vpack.c.bf16 %v1238_v46, %v1237_v43  ;;  %v4354_v43 = vpop.permute.xlu1 %1698 }
 0x135   : > { %v1078_v60 = vadd.f32 %v4254_v54, %v983_v42 }
 0x136   : > { %1416 = vmatmul.bf16.vlgmr.msrb.gmra.mxu0 %v1239_v47  ;;  %1430 = vmatmul.bf16.vlgmr.msrb.gmra.mxu1 %v1239_v47 }
 0x137   : > { %1444 = vmatmul.bf16.vlgmr.msra.gmra.mxu2 %v1239_v47  ;;  %v4356_v47 = vperm.slane %v944_v39, 0 }
 0x138   : > { %v4351_v41 = vpop.permute.xlu2 %1694 }
 0x13a   : > { %v4275_v0 = vpop.f32.mrf.mxu0 }
 0x142   : > { %v4290_v6 = vpop.f32.mrf.mxu0 }
 0x147   : > { %3308 = vmatmul.msk.bf16.vlgmr.msrb.gmra.mxu2 %vm1495_vm10, %v4279_v2 }
 0x157   : > { %3309 = vmatmul.msk.bf16.gmra.mxu2 %vm1495_vm10, %v3712_v17 }
 0x167   : > { %3310 = vmatmul.msk.bf16.gmra.mxu2 %vm1495_vm10, %v3713_v34 }
 0x1b3   : > { %v1417_v12 = vpop.f32.mrf.mxu0  ;;  %v1431_v13 = vpop.f32.mrf.mxu1 }
 0x1b4   : > { %v1418_v14 = vadd.f32 %v1417_v12, %v1274_v10  ;;  %v1432_v15 = vadd.f32 %v1431_v13, %v1275_v11  ;;  %v4364_v12 = vpop.permute.xlu2 %1756 }
 0x1ba   : > { %v1445_v19 = vpop.f32.mrf.mxu2 }
 0x1bb   : > { %v1446_v23 = vadd.f32 %v1445_v19, %v1276_v18  ;;  %v1419_v24 = vpop.f32.mrf.mxu0  ;;  %v1433_v26 = vpop.f32.mrf.mxu1 }
 0x1bc   : > { %v1420_v27 = vadd.f32 %v1419_v24, %v1274_v10  ;;  %v1434_v28 = vadd.f32 %v1433_v26, %v1275_v11  ;;  %v986_v10 = vmul.f32 %v960_v38, %v4349_v40 }
 0x1be   : > { %v1474_v30 = vpack.c.bf16 %v1420_v27, %v1418_v14  ;;  %v1475_v32 = vpack.c.bf16 %v1434_v28, %v1432_v15  ;;  %v1687_v14 = vpop.permute.xlu1 %1686  ;;  %v1102_v15 = vadd.f32 %v4250_v50, %v984_v8  ;;  %v1080_v54 = vadd.f32 %v4260_v57, %v986_v10  ;;  %v975_v57 = vpop.permute.xlu0 %974 }
 0x1bf   : > { %v985_v27 = vmul.f32 %v960_v38, %v4356_v47  ;;  %v989_v50 = vmul.f32 %v965_v45, %v4349_v40  ;;  %v990_v8 = vmul.f32 %v965_v45, %v4358_v48 }
 0x1c0   : > { %1512 = vmatpush.bf16.msra.mxu3 %v1474_v30  ;;  %1536 = vmatpush.bf16.msra.mxu0 %v1475_v32 }
 0x1c1   : > { %v1083_v39 = vadd.f32 %v4268_v61, %v989_v50  ;;  %v992_v61 = vmul.f32 %v4340_v36, %v4349_v40 }
 0x1c2   : > { %v1447_v33 = vpop.f32.mrf.mxu2 }
 0x1c3   : > { %v1448_v16 = vadd.f32 %v1447_v33, %v1276_v18  ;;  %3299 = vmatmul.msk.bf16.vlgmr.msra.gmra.mxu3 %vm1495_vm10, %v4279_v2  ;;  %3302 = vmatmul.msk.bf16.vlgmr.msra.gmra.mxu0 %vm1495_vm10, %v4279_v2  ;;  %v1056_v33 = vadd.f32 %v4262_v58, %v985_v27  ;;  %v988_v58 = vmul.f32 %v965_v45, %v4356_v47 }
 0x1c4   : > { %1608 = vmatpush.bf16.msrb.mxu3 %v1478_v44  ;;  %1632 = vmatpush.bf16.msrb.mxu0 %v1479_v29 }
 0x1c5   : > { %v1476_v35 = vpack.c.bf16 %v1448_v16, %v1446_v23 }
 0x1c6   : > { %v4381_v42 = vpop.permute.xlu1 %1748 }
 0x1c7   : > { %1560 = vmatpush.bf16.msra.mxu1 %v1476_v35 }
 0x1ca   : > { %3305 = vmatmul.msk.bf16.vlgmr.msra.gmra.mxu1 %vm1495_vm10, %v4279_v2  ;;  %v1586_v46 = vpop.f32.mrf.mxu2 }
 0x1d2   : > { %v1588_v18 = vpop.f32.mrf.mxu2 }
 0x1d3   : > { %3300 = vmatmul.msk.bf16.gmra.mxu3 %vm1495_vm10, %v3712_v17  ;;  %3303 = vmatmul.msk.bf16.gmra.mxu0 %vm1495_vm10, %v3712_v17 }
 0x1da   : > { %3306 = vmatmul.msk.bf16.gmra.mxu1 %vm1495_vm10, %v3712_v17 }
 0x1e3   : > { %3301 = vmatmul.msk.bf16.gmra.mxu3 %vm1495_vm10, %v3713_v34  ;;  %3304 = vmatmul.msk.bf16.gmra.mxu0 %vm1495_vm10, %v3713_v34 }
 0x1ea   : > { %3307 = vmatmul.msk.bf16.gmra.mxu1 %vm1495_vm10, %v3713_v34 }
 0x1f3   : > { %3311 = vmatmul.msk.bf16.vlgmr.msrb.gmra.mxu3 %vm1495_vm10, %v4279_v2  ;;  %3314 = vmatmul.msk.bf16.vlgmr.msrb.gmra.mxu0 %vm1495_vm10, %v4279_v2  ;;  %v982_v2 = vmul.f32 %v955_v53, %v4356_v47 }
 0x1f5   : > { %v1054_v13 = vadd.f32 %v4256_v55, %v982_v2  ;;  %v987_v55 = vmul.f32 %v960_v38, %v4358_v48  ;;  %v1591_v2 = vpop.f32.mrf.mxu2 }
 0x1f7   : > { %v1104_v16 = vadd.f32 %v4252_v51, %v987_v55  ;;  %v4404_v55 = vpop.permute.xlu1 %1744 }
 0x203   : > { %3312 = vmatmul.msk.bf16.gmra.mxu3 %vm1495_vm10, %v3712_v17  ;;  %3315 = vmatmul.msk.bf16.gmra.mxu0 %vm1495_vm10, %v3712_v17 }
 0x213   : > { %3313 = vmatmul.msk.bf16.gmra.mxu3 %vm1495_vm10, %v3713_v34  ;;  %3316 = vmatmul.msk.bf16.gmra.mxu0 %vm1495_vm10, %v3713_v34  ;;  %v1691_v34 = vpop.permute.xlu2 %1690 }
 0x21b   : > { %v4398_v27 = vpop.permute.xlu2 %1752 }
 0x240   : > { %v1538_v1 = vpop.f32.mrf.mxu0 }
 0x241   : > { %v1650_v7 = vmul.f32 %v1538_v1, %v1078_v60 }
 0x243   : > { %v1667_v11 = vpack.c.bf16 %v1650_v7, %v1650_v7 }
 0x245   : > { %1673 = vst [vmem:[#allocation7] sm:$0xf] %v1667_v11 }
 0x246   : > { %v1514_v17 = vpop.f32.mrf.mxu3 }
 0x247   : > { %v4369_v19 = vmul.f32 %v1514_v17, %v1054_v13  ;;  %v1562_v23 = vpop.f32.mrf.mxu1 }
 0x248   : > { %v4371_v24 = vmul.f32 %v1562_v23, %v1102_v15  ;;  %v1540_v26 = vpop.f32.mrf.mxu0  ;;  %v1107_v15 = vadd.f32 %v4258_v56, %v990_v8  ;;  %v980_v23 = vpop.permute.xlu0 %979  ;;  %v996_v8 = vmul.f32 %v975_v57, %v4358_v48 }
 0x249   : > { %v1653_v28 = vmul.f32 %v1540_v26, %v1080_v54  ;;  %v1679_v44 = vmul.f32 %v4369_v19, %v1586_v46  ;;  %v1085_v26 = vadd.f32 %v4288_v5, %v992_v61  ;;  %v993_v5 = vmul.f32 %v4340_v36, %v4358_v48  ;;  %v4427_v61 = vpop.permute.xlu1 %1802 }
 0x24a   : > { %v1709_v29 = vmul.f32 %v1687_v14, %v4371_v24  ;;  %v1059_v14 = vadd.f32 %v4275_v0, %v988_v58  ;;  %v991_v0 = vmul.f32 %v4340_v36, %v4356_v47 }
 0x24b   : > { %v1668_v30 = vpack.c.bf16 %v1653_v28, %v1653_v28 }
 0x24c   : > { %v1715_v32 = vadd.f32 %v1709_v29, %v1679_v44 }
 0x24d   : > { %1674 = vst [vmem:[#allocation7 + $0x10] sm:$0xf] %v1668_v30  ;;  %v1593_v30 = vpop.f32.mrf.mxu2 }
 0x24e   : > { %v1721_v35 = vpack.c.bf16 %v1715_v32, %v1715_v32  ;;  %v1516_v53 = vpop.f32.mrf.mxu3  ;;  %v995_v32 = vmul.f32 %v975_v57, %v4349_v40 }
 0x24f   : > { %v4383_v38 = vmul.f32 %v1516_v53, %v1056_v33  ;;  %v1564_v46 = vpop.f32.mrf.mxu1 }
 0x250   : > { %1727 = vst [vmem:[#allocation7 + $0x4] sm:$0xf] %v1721_v35  ;;  %v4385_v60 = vmul.f32 %v1564_v46, %v1104_v16  ;;  %v1543_v1 = vpop.f32.mrf.mxu0  ;;  %v1109_v35 = vadd.f32 %v4264_v59, %v993_v5  ;;  %v1088_v46 = vadd.f32 %v4186_v3, %v995_v32  ;;  %v4422_v59 = vpop.permute.xlu2 %1810 }
 0x251   : > { %v1656_v7 = vmul.f32 %v1543_v1, %v1083_v39  ;;  %v1680_v51 = vmul.f32 %v4383_v38, %v1588_v18 }
 0x252   : > { %v1710_v10 = vmul.f32 %v1691_v34, %v4385_v60  ;;  %v1061_v34 = vadd.f32 %v4290_v6, %v991_v0  ;;  %v997_v0 = vmul.f32 %v980_v23, %v4356_v47 }
 0x253   : > { %v1669_v11 = vpack.c.bf16 %v1656_v7, %v1656_v7  ;;  %v994_v7 = vmul.f32 %v975_v57, %v4356_v47 }
 0x254   : > { %v1716_v13 = vadd.f32 %v1710_v10, %v1680_v51  ;;  %v998_v10 = vmul.f32 %v980_v23, %v4349_v40  ;;  %v1066_v32 = vadd.f32 %v4246_v49, %v997_v0  ;;  %v3717_v0 = vld [vmem:[#allocation7 + $0xc] sm:$0xf0] }
 0x255   : > { %1675 = vst [vmem:[#allocation7 + $0x20] sm:$0xf] %v1669_v11 }
 0x256   : > { %v1722_v17 = vpack.c.bf16 %v1716_v13, %v1716_v13  ;;  %v1519_v54 = vpop.f32.mrf.mxu3  ;;  %v1090_v57 = vadd.f32 %v4204_v31, %v998_v10 }
 0x257   : > { %v4396_v18 = vmul.f32 %v1519_v54, %v1059_v14  ;;  %v1567_v45 = vpop.f32.mrf.mxu1  ;;  %v1596_v14 = vpop.f32.mrf.mxu2 }
 0x258   : > { %1728 = vst [vmem:[#allocation7 + $0x14] sm:$0xf] %v1722_v17  ;;  %v4400_v28 = vmul.f32 %v1567_v45, %v1107_v15  ;;  %v1545_v44 = vpop.f32.mrf.mxu0  ;;  %v1064_v15 = vadd.f32 %v4241_v25, %v994_v7  ;;  %v1112_v17 = vadd.f32 %v4281_v4, %v996_v8  ;;  %v999_v25 = vmul.f32 %v980_v23, %v4358_v48  ;;  %v4442_v31 = vpop.permute.xlu2 %1806 }
 0x259   : > { %v1659_v56 = vmul.f32 %v1545_v44, %v1085_v26  ;;  %v1681_v29 = vmul.f32 %v4396_v18, %v1591_v2  ;;  %v1703_v2 = vpop.permute.xlu0 %1702 }
 0x25a   : > { %v1711_v50 = vmul.f32 %v4351_v41, %v4400_v28 }
 0x25b   : > { %v1670_v33 = vpack.c.bf16 %v1659_v56, %v1659_v56 }
 0x25c   : > { %v1717_v16 = vadd.f32 %v1711_v50, %v1681_v29 }
 0x25d   : > { %1676 = vst [vmem:[#allocation7 + $0x30] sm:$0xf] %v1670_v33  ;;  %v1795_v33 = vpop.permute.xlu1 %1794 }
 0x25e   : > { %v1723_v53 = vpack.c.bf16 %v1717_v16, %v1717_v16  ;;  %v1521_v39 = vpop.f32.mrf.mxu3  ;;  %v1114_v16 = vadd.f32 %v4298_v9, %v999_v25  ;;  %v3323_v25 = vld [vmem:[#allocation7] sm:$0xf] }
 0x25f   : > { %v4415_v1 = vmul.f32 %v1521_v39, %v1061_v34  ;;  %v1569_v36 = vpop.f32.mrf.mxu1 }
 0x260   : > { %1729 = vst [vmem:[#allocation7 + $0x24] sm:$0xf] %v1723_v53  ;;  %v4417_v41 = vmul.f32 %v1569_v36, %v1109_v35  ;;  %v1548_v58 = vpop.f32.mrf.mxu0  ;;  %v1598_v35 = vpop.f32.mrf.mxu2 }
 0x261   : > { %v1662_v51 = vmul.f32 %v1548_v58, %v1088_v46  ;;  %v1682_v6 = vmul.f32 %v4415_v1, %v1593_v30  ;;  %v4439_v5 = vpop.permute.xlu0 %1760  ;;  %v1817_v46 = vmul.f32 %v1795_v33, %v4371_v24  ;;  %v1799_v10 = vpop.permute.xlu2 %1798 }
 0x262   : > { %v1712_v3 = vmul.f32 %v4354_v43, %v4417_v41 }
 0x263   : > { %v1671_v11 = vpack.c.bf16 %v1662_v51, %v1662_v51 }
 0x264   : > { %v1718_v13 = vadd.f32 %v1712_v3, %v1682_v6 }
 0x265   : > { %1677 = vst [vmem:[#allocation7 + $0x40] sm:$0xf] %v1671_v11 }
 0x266   : > { %v1724_v54 = vpack.c.bf16 %v1718_v13, %v1718_v13  ;;  %v1524_v26 = vpop.f32.mrf.mxu3 }
 0x267   : > { %v4432_v45 = vmul.f32 %v1524_v26, %v1064_v15  ;;  %v1572_v44 = vpop.f32.mrf.mxu1  ;;  %v1818_v26 = vmul.f32 %v1799_v10, %v4385_v60  ;;  %v1820_v10 = vmul.f32 %v4442_v31, %v4417_v41 }
 0x268   : > { %1730 = vst [vmem:[#allocation7 + $0x34] sm:$0xf] %v1724_v54  ;;  %v4434_v43 = vmul.f32 %v1572_v44, %v1112_v17  ;;  %v1550_v40 = vpop.f32.mrf.mxu0 }
 0x269   : > { %v1665_v56 = vmul.f32 %v1550_v40, %v1090_v57  ;;  %v1683_v29 = vmul.f32 %v4432_v45, %v1596_v14  ;;  %v1741_v58 = vpop.permute.xlu0 %1740  ;;  %v3721_v14 = vld [vmem:[#allocation7 + $0x2c] sm:$0xf0] }
 0x26a   : > { %v1713_v4 = vmul.f32 %v1703_v2, %v4434_v43  ;;  %v1763_v15 = vmul.f32 %v1741_v58, %v4371_v24  ;;  %v1765_v58 = vmul.f32 %v4381_v42, %v4400_v28 }
 0x26b   : > { %v1672_v50 = vpack.c.bf16 %v1665_v56, %v1665_v56 }
 0x26c   : > { %v1719_v30 = vadd.f32 %v1713_v4, %v1683_v29  ;;  %v3355_v51 = vld [vmem:[#allocation7 + $0x40] sm:$0xf]  ;;  %v3324_v4 = vor.u32 %v3717_v0, %v3323_v25  ;;  %v3742_v25 = vld [vmem:[%s4055_s29 + $0x74] sm:$0xf0] }
 0x26d   : > { %1678 = vst [vmem:[#allocation7 + $0x50] sm:$0xf] %v1672_v50 }
 0x26e   : > { %v1725_v47 = vpack.c.bf16 %v1719_v30, %v1719_v30  ;;  %v1526_v34 = vpop.f32.mrf.mxu3  ;;  %v1764_v30 = vmul.f32 %v4404_v55, %v4385_v60 }
 0x26f   : > { %v4446_v53 = vmul.f32 %v1526_v34, %v1066_v32  ;;  %v1574_v48 = vpop.f32.mrf.mxu1 }
 0x270   : > { %1731 = vst [vmem:[#allocation7 + $0x44] sm:$0xf] %v1725_v47  ;;  %v4448_v23 = vmul.f32 %v1574_v48, %v1114_v16  ;;  %v1634_v39 = vpop.f32.mrf.mxu0  ;;  %v1819_v48 = vmul.f32 %v4427_v61, %v4400_v28  ;;  %v1766_v28 = vmul.f32 %v4398_v27, %v4417_v41  ;;  %v1767_v41 = vmul.f32 %v4364_v12, %v4434_v43 }
 0x271   : > { %v1684_v36 = vmul.f32 %v4446_v53, %v1598_v35  ;;  %v1787_v49 = vmul.f32 %v4369_v19, %v1634_v39  ;;  %v3341_v39 = vld [vmem:[#allocation7 + $0x30] sm:$0xf0] }
 0x272   : > { %v1714_v2 = vmul.f32 %v4342_v37, %v4448_v23  ;;  %v3339_v37 = vld [vmem:[#allocation7 + $0x20] sm:$0xf] }
 0x273   : > { %v1823_v9 = vadd.f32 %v1817_v46, %v1787_v49  ;;  %v3340_v40 = vor.u32 %v3721_v14, %v3339_v37  ;;  %v4465_v46 = vld [vmem:[#allocation5] sm:$0xff]  ;;  %v3719_v49 = vld [vmem:[#allocation7 + $0x24] sm:$0xf] }
 0x274   : > { %v1720_v7 = vadd.f32 %v1714_v2, %v1684_v36  ;;  %v3725_v6 = vld [vmem:[#allocation7 + $0x4c] sm:$0xf0]  ;;  %v3344_v60 = vor.u32 %v3719_v49, %v3341_v39  ;;  %v3325_v2 = vld [vmem:[#allocation7 + $0x10] sm:$0xf0]  ;;  %v3738_v39 = vld [vmem:[%s4055_s29 + $0x54] sm:$0xf0] }
 0x275   : > { %v1829_v8 = vpack.c.bf16 %v1823_v9, %v1823_v9  ;;  %v3356_v3 = vor.u32 %v3725_v6, %v3355_v51  ;;  %v3737_v49 = vld [vmem:[%s4055_s29 + $0x54] sm:$0xf] }
 0x276   : > { %v1726_v11 = vpack.c.bf16 %v1720_v7, %v1720_v7  ;;  %v1610_v13 = vpop.f32.mrf.mxu3  ;;  %v3715_v7 = vld [vmem:[#allocation7 + $0x4] sm:$0xf] }
 0x277   : > { %1835 = vst [vmem:[#allocation7 + $0xc] sm:$0xf] %v1829_v8  ;;  %v1733_v17 = vmul.f32 %v4369_v19, %v1610_v13  ;;  %1929 = vmatpush.bf16.msrb.mxu1 %v3356_v3  ;;  %v3723_v32 = vld [vmem:[#allocation7 + $0x44] sm:$0xf]  ;;  %v3328_v6 = vor.u32 %v3715_v7, %v3325_v2 }
 0x278   : > { %1732 = vst [vmem:[#allocation7 + $0x54] sm:$0xf] %v1726_v11  ;;  %v1636_v54 = vpop.f32.mrf.mxu0 }
 0x279   : > { %v1769_v57 = vadd.f32 %v1763_v15, %v1733_v17  ;;  %v1788_v44 = vmul.f32 %v4383_v38, %v1636_v54  ;;  %v1821_v54 = vmul.f32 %v4422_v59, %v4434_v43  ;;  %v3739_v43 = vld [vmem:[%s4055_s29 + $0x64] sm:$0xf] }
 0x27b   : > { %v1775_v56 = vpack.c.bf16 %v1769_v57, %v1769_v57  ;;  %v1824_v29 = vadd.f32 %v1818_v26, %v1788_v44  ;;  %1930 = vmatpush.bf16.msrb.mxu1 %v3340_v40  ;;  %v1815_v44 = vpop.permute.xlu0 %1814 }
 0x27c   : > { %v1822_v59 = vmul.f32 %v1815_v44, %v4448_v23  ;;  %v3399_v44 = vld [vmem:[%s4055_s29 + $0x30] sm:$0xf] }
 0x27d   : > { %1781 = vst [vmem:[#allocation7 + $0x8] sm:$0xf] %v1775_v56  ;;  %v1830_v24 = vpack.c.bf16 %v1824_v29, %v1824_v29  ;;  %v3431_v29 = vld [vmem:[%s4055_s29 + $0x70] sm:$0xf] }
 0x27e   : > { %v1612_v50 = vpop.f32.mrf.mxu3 }
 0x27f   : > { %1836 = vst [vmem:[#allocation7 + $0x1c] sm:$0xf] %v1830_v24  ;;  %v1734_v19 = vmul.f32 %v4383_v38, %v1612_v50  ;;  %1931 = vmatpush.bf16.msrb.mxu1 %v3324_v4  ;;  %v3357_v33 = vld [vmem:[#allocation7 + $0x50] sm:$0xf0] }
 0x280   : > { %v1639_v16 = vpop.f32.mrf.mxu0  ;;  %v3360_v47 = vor.u32 %v3723_v32, %v3357_v33  ;;  %v3741_v24 = vld [vmem:[%s4055_s29 + $0x74] sm:$0xf]  ;;  %v3740_v32 = vld [vmem:[%s4055_s29 + $0x64] sm:$0xf0]  ;;  %v3425_v33 = vld [vmem:[%s4055_s29 + $0x68] sm:$0xf0] }
 0x281   : > { %v1770_v34 = vadd.f32 %v1764_v30, %v1734_v19  ;;  %v1789_v35 = vmul.f32 %v4396_v18, %v1639_v16  ;;  %v4491_v19 = vor.u32 %v3742_v25, %v3431_v29  ;;  %v3423_v30 = vld [vmem:[%s4055_s29 + $0x60] sm:$0xf]  ;;  %v3731_v29 = vld [vmem:[%s4055_s29 + $0x24] sm:$0xf] }
 0x282   : > { %1943 = vmatpush.bf16.msra.mxu2 %v3360_v47  ;;  %3369 = vmatmul.msk.bf16.vlgmr.msrb.gmra.mxu1 %vm1920_vm11, %v4465_v46  ;;  %v4501_v47 = vor.u32 %v3740_v32, %v3423_v30  ;;  %v3729_v30 = vld [vmem:[%s4055_s29 + $0x14] sm:$0xf]  ;;  %v3385_v32 = vld [vmem:[%s4055_s29 + $0x18] sm:$0xf0] }
 0x283   : > { %v1776_v38 = vpack.c.bf16 %v1770_v34, %v1770_v34  ;;  %v1825_v36 = vadd.f32 %v1819_v48, %v1789_v35  ;;  %2106 = vmatpush.bf16.msra.mxu3 %v4491_v19  ;;  %v4504_v35 = vor.u32 %v3739_v43, %v3425_v33  ;;  %v3415_v48 = vld [vmem:[%s4055_s29 + $0x50] sm:$0xf]  ;;  %v3388_v33 = vor.u32 %v3729_v30, %v3385_v32 }
 0x284   : > { %v4514_v2 = vor.u32 %v3738_v39, %v3415_v48  ;;  %v3727_v48 = vld [vmem:[%s4055_s29 + $0x4] sm:$0xf] }
 0x285   : > { %1782 = vst [vmem:[#allocation7 + $0x18] sm:$0xf] %v1776_v38  ;;  %v1831_v55 = vpack.c.bf16 %v1825_v36, %v1825_v36  ;;  %v1768_v36 = vmul.f32 %v4439_v5, %v4448_v23 }
 0x286   : > { %1944 = vmatpush.bf16.msra.mxu2 %v3344_v60  ;;  %v1615_v9 = vpop.f32.mrf.mxu3  ;;  %v3417_v60 = vld [vmem:[%s4055_s29 + $0x58] sm:$0xf0] }
 0x287   : > { %1837 = vst [vmem:[#allocation7 + $0x2c] sm:$0xf] %v1831_v55  ;;  %v1735_v61 = vmul.f32 %v4396_v18, %v1615_v9  ;;  %2107 = vmatpush.bf16.msra.mxu3 %v4501_v47  ;;  %v4517_v9 = vor.u32 %v3737_v49, %v3417_v60  ;;  %v3758_v49 = vld [vmem:[%s4071_s20 + $0x38] sm:$0xff]  ;;  %v3757_v60 = vld [vmem:[%s4071_s20 + $0x30] sm:$0xff] }
 0x288   : > { %v1641_v51 = vpop.f32.mrf.mxu0 }
 0x289   : > { %v1771_v8 = vadd.f32 %v1765_v58, %v1735_v61  ;;  %v1790_v3 = vmul.f32 %v4415_v1, %v1641_v51 }
 0x28a   : > { %1945 = vmatpush.bf16.msra.mxu2 %v3328_v6 }
 0x28b   : > { %v1777_v11 = vpack.c.bf16 %v1771_v8, %v1771_v8  ;;  %v1826_v13 = vadd.f32 %v1820_v10, %v1790_v3  ;;  %2108 = vmatpush.bf16.msra.mxu3 %v4514_v2  ;;  %v3333_v3 = vld [vmem:[#allocation7 + $0x18] sm:$0xf0] }
 0x28d   : > { %1783 = vst [vmem:[#allocation7 + $0x28] sm:$0xf] %v1777_v11  ;;  %v1832_v14 = vpack.c.bf16 %v1826_v13, %v1826_v13  ;;  %3370 = vmatmul.msk.bf16.vlgmr.msra.gmra.mxu2 %vm1920_vm11, %v4465_v46  ;;  %v3716_v11 = vld [vmem:[#allocation7 + $0xc] sm:$0xf] }
 0x28e   : > { %v1617_v18 = vpop.f32.mrf.mxu3  ;;  %v3720_v7 = vld [vmem:[#allocation7 + $0x2c] sm:$0xf] }
 0x28f   : > { %1838 = vst [vmem:[#allocation7 + $0x3c] sm:$0xf] %v1832_v14  ;;  %v1736_v42 = vmul.f32 %v4415_v1, %v1617_v18  ;;  %v3336_v14 = vor.u32 %v3716_v11, %v3333_v3 }
 0x290   : > { %v1644_v15 = vpop.f32.mrf.mxu0 }
 0x291   : > { %v1772_v17 = vadd.f32 %v1766_v28, %v1736_v42  ;;  %v1791_v31 = vmul.f32 %v4432_v45, %v1644_v15  ;;  %v3718_v28 = vld [vmem:[#allocation7 + $0x14] sm:$0xf0]  ;;  %v3331_v15 = vld [vmem:[#allocation7 + $0x8] sm:$0xf] }
 0x293   : > { %v1778_v37 = vpack.c.bf16 %v1772_v17, %v1772_v17  ;;  %v1827_v26 = vadd.f32 %v1821_v54, %v1791_v31  ;;  %v3332_v17 = vor.u32 %v3718_v28, %v3331_v15  ;;  %v3407_v31 = vld [vmem:[%s4055_s29 + $0x40] sm:$0xf]  ;;  %v3736_v54 = vld [vmem:[%s4055_s29 + $0x44] sm:$0xf0] }
 0x294   : > { %v3347_v18 = vld [vmem:[#allocation7 + $0x28] sm:$0xf] }
 0x295   : > { %1784 = vst [vmem:[#allocation7 + $0x38] sm:$0xf] %v1778_v37  ;;  %v1833_v57 = vpack.c.bf16 %v1827_v26, %v1827_v26  ;;  %v3735_v37 = vld [vmem:[%s4055_s29 + $0x44] sm:$0xf]  ;;  %v3408_v26 = vor.u32 %v3736_v54, %v3407_v31 }
 0x296   : > { %v1620_v1 = vpop.f32.mrf.mxu3  ;;  %v3349_v23 = vld [vmem:[#allocation7 + $0x38] sm:$0xf0] }
 0x297   : > { %1839 = vst [vmem:[#allocation7 + $0x4c] sm:$0xf] %v1833_v57  ;;  %v1737_v27 = vmul.f32 %v4432_v45, %v1620_v1  ;;  %v3433_v45 = vld [vmem:[%s4055_s29 + $0x78] sm:$0xf0]  ;;  %v3352_v51 = vor.u32 %v3720_v7, %v3349_v23  ;;  %v3409_v57 = vld [vmem:[%s4055_s29 + $0x48] sm:$0xf0]  ;;  %2109 = vmatpush.bf16.msra.mxu3 %v3408_v26 }
 0x298   : > { %v1646_v40 = vpop.f32.mrf.mxu0  ;;  %v4496_v12 = vor.u32 %v3741_v24, %v3433_v45  ;;  %v3734_v1 = vld [vmem:[%s4055_s29 + $0x34] sm:$0xf0]  ;;  %v3393_v24 = vld [vmem:[%s4055_s29 + $0x28] sm:$0xf0] }
 0x299   : > { %v1773_v0 = vadd.f32 %v1767_v41, %v1737_v27  ;;  %v1792_v56 = vmul.f32 %v4446_v53, %v1646_v40  ;;  %v3412_v27 = vor.u32 %v3735_v37, %v3409_v57  ;;  %v3733_v41 = vld [vmem:[%s4055_s29 + $0x34] sm:$0xf]  ;;  %v3400_v40 = vor.u32 %v3734_v1, %v3399_v44  ;;  %v3855_v37 = vld [vmem:[#allocation2] sm:$0xff]  ;;  %v3750_v1 = vld [vmem:[%s4061_s23 + $0x38] sm:$0xff] }
 0x29a   : > { %2120 = vmatpush.bf16.msra.mxu0 %v4496_v12  ;;  %v3396_v45 = vor.u32 %v3731_v29, %v3393_v24 }
 0x29b   : > { %v1779_v4 = vpack.c.bf16 %v1773_v0, %v1773_v0  ;;  %v1828_v50 = vadd.f32 %v1822_v59, %v1792_v56  ;;  %2110 = vmatpush.bf16.msra.mxu3 %v3400_v40  ;;  %v3391_v0 = vld [vmem:[%s4055_s29 + $0x20] sm:$0xf]  ;;  %v3732_v56 = vld [vmem:[%s4055_s29 + $0x24] sm:$0xf0] }
 0x29c   : > { %v3722_v13 = vld [vmem:[#allocation7 + $0x34] sm:$0xf0]  ;;  %v3392_v25 = vor.u32 %v3732_v56, %v3391_v0 }
 0x29d   : > { %1785 = vst [vmem:[#allocation7 + $0x48] sm:$0xf] %v1779_v4  ;;  %v1834_v16 = vpack.c.bf16 %v1828_v50, %v1828_v50  ;;  %v3348_v42 = vor.u32 %v3722_v13, %v3347_v18  ;;  %v3383_v4 = vld [vmem:[%s4055_s29 + $0x10] sm:$0xf]  ;;  %v3730_v50 = vld [vmem:[%s4055_s29 + $0x14] sm:$0xf0] }
 0x29e   : > { %v1622_v34 = vpop.f32.mrf.mxu3  ;;  %2121 = vmatpush.bf16.msra.mxu0 %v4504_v35  ;;  %v3724_v58 = vld [vmem:[#allocation7 + $0x4c] sm:$0xf]  ;;  %v3384_v43 = vor.u32 %v3730_v50, %v3383_v4 }
 0x29f   : > { %1840 = vst [vmem:[#allocation7 + $0x5c] sm:$0xf] %v1834_v16  ;;  %v1738_v38 = vmul.f32 %v4446_v53, %v1622_v34  ;;  %2111 = vmatpush.bf16.msra.mxu3 %v3392_v25  ;;  %v3375_v16 = vld [vmem:[%s4055_s29] sm:$0xf]  ;;  %v3728_v34 = vld [vmem:[%s4055_s29 + $0x4] sm:$0xf0] }
 0x2a0   : > { %v3376_v39 = vor.u32 %v3728_v34, %v3375_v16 }
 0x2a1   : > { %v1774_v55 = vadd.f32 %v1768_v36, %v1738_v38  ;;  %v3377_v38 = vld [vmem:[%s4055_s29 + $0x8] sm:$0xf0] }
 0x2a2   : > { %2122 = vmatpush.bf16.msra.mxu0 %v4517_v9  ;;  %v3380_v36 = vor.u32 %v3727_v48, %v3377_v38 }
 0x2a3   : > { %v1780_v61 = vpack.c.bf16 %v1774_v55, %v1774_v55  ;;  %2112 = vmatpush.bf16.msra.mxu3 %v3384_v43  ;;  %v3756_v55 = vld [vmem:[%s4071_s20 + $0x28] sm:$0xff] }
 0x2a4   : > { %v3363_v6 = vld [vmem:[#allocation7 + $0x48] sm:$0xf] }
 0x2a5   : > { %1786 = vst [vmem:[#allocation7 + $0x58] sm:$0xf] %v1780_v61 }
 0x2a6   : > { %v3365_v53 = vld [vmem:[#allocation7 + $0x58] sm:$0xf0]  ;;  %2123 = vmatpush.bf16.msra.mxu0 %v3412_v27 }
 0x2a7   : > { %v3368_v5 = vor.u32 %v3724_v58, %v3365_v53  ;;  %2113 = vmatpush.bf16.msra.mxu3 %v3376_v39  ;;  %v3751_v53 = vld [vmem:[%s4071_s20] sm:$0xff] }
 0x2a9   : > { %1971 = vmatpush.bf16.msrb.mxu2 %v3368_v5 }
 0x2ab   : > { %2172 = vmatpush.bf16.msrb.mxu3 %v4491_v19 }
 0x2ac   : > { %v3726_v8 = vld [vmem:[#allocation7 + $0x54] sm:$0xf0] }
 0x2ad   : > { %1972 = vmatpush.bf16.msrb.mxu2 %v3352_v51  ;;  %v3364_v10 = vor.u32 %v3726_v8, %v3363_v6 }
 0x2af   : > { %1957 = vmatpush.bf16.msra.mxu1 %v3364_v10  ;;  %2173 = vmatpush.bf16.msrb.mxu3 %v4501_v47 }
 0x2b1   : > { %1973 = vmatpush.bf16.msrb.mxu2 %v3336_v14 }
 0x2b3   : > { %1958 = vmatpush.bf16.msra.mxu1 %v3348_v42  ;;  %2174 = vmatpush.bf16.msrb.mxu3 %v4514_v2 }
 0x2b4   : > { %3372 = vmatmul.msk.bf16.vlgmr.msrb.gmra.mxu2 %vm1920_vm11, %v4465_v46 }
 0x2b5   : > { %2152 = vmatpush.bf16.msra.mxu2 %v4496_v12 }
 0x2b7   : > { %1959 = vmatpush.bf16.msra.mxu1 %v3332_v17  ;;  %2175 = vmatpush.bf16.msrb.mxu3 %v3408_v26 }
 0x2b9   : > { %2153 = vmatpush.bf16.msra.mxu2 %v4504_v35 }
 0x2ba   : > { %3371 = vmatmul.msk.bf16.vlgmr.msra.gmra.mxu1 %vm1920_vm11, %v4465_v46  ;;  %v3401_v46 = vld [vmem:[%s4055_s29 + $0x38] sm:$0xf0] }
 0x2bb   : > { %2138 = vmatpush.bf16.msrb.mxu1 %v4491_v19  ;;  %v3404_v59 = vor.u32 %v3733_v41, %v3401_v46  ;;  %v3755_v19 = vld [vmem:[%s4071_s20 + $0x20] sm:$0xff]  ;;  %2176 = vmatpush.bf16.msrb.mxu3 %v3400_v40  ;;  %v3748_v41 = vld [vmem:[%s4061_s23 + $0x28] sm:$0xff] }
 0x2bc   : > { %v2014_v46 = vld [vmem:[%s4066_s24] sm:$0x3] }
 0x2bd   : > { %2154 = vmatpush.bf16.msra.mxu2 %v4517_v9  ;;  %2124 = vmatpush.bf16.msra.mxu0 %v3404_v59  ;;  %v2017_v0 = vperm.slane %v2014_v46, 1  ;;  %v2016_v29 = vperm.slane %v2014_v46, 0 }
 0x2bf   : > { %2139 = vmatpush.bf16.msrb.mxu1 %v4501_v47  ;;  %v3753_v47 = vld [vmem:[%s4071_s20 + $0x10] sm:$0xff]  ;;  %2177 = vmatpush.bf16.msrb.mxu3 %v3392_v25 }
 0x2c1   : > { %2155 = vmatpush.bf16.msra.mxu2 %v3412_v27  ;;  %2125 = vmatpush.bf16.msra.mxu0 %v3396_v45 }
 0x2c3   : > { %2140 = vmatpush.bf16.msrb.mxu1 %v4514_v2  ;;  %v3752_v2 = vld [vmem:[%s4071_s20 + $0x8] sm:$0xff]  ;;  %2178 = vmatpush.bf16.msrb.mxu3 %v3384_v43 }
 0x2c5   : > { %2156 = vmatpush.bf16.msra.mxu2 %v3404_v59  ;;  %2126 = vmatpush.bf16.msra.mxu0 %v3388_v33 }
 0x2c7   : > { %2141 = vmatpush.bf16.msrb.mxu1 %v3408_v26  ;;  %2179 = vmatpush.bf16.msrb.mxu3 %v3376_v39 }
 0x2c9   : > { %2157 = vmatpush.bf16.msra.mxu2 %v3396_v45  ;;  %2127 = vmatpush.bf16.msra.mxu0 %v3380_v36 }
 0x2cb   : > { %2142 = vmatpush.bf16.msrb.mxu1 %v3400_v40 }
 0x2cd   : > { %2158 = vmatpush.bf16.msra.mxu2 %v3388_v33  ;;  %2186 = vmatpush.bf16.msrb.mxu0 %v4496_v12  ;;  %v3754_v12 = vld [vmem:[%s4071_s20 + $0x18] sm:$0xff]  ;;  %s4834_s20 = scalar_lea.vmem %s4785_s17, %s4030_s27  ;;  %s4835_s27 = sld [smem:[#allocation17_spill]] }
 0x2cf   : > { %2143 = vmatpush.bf16.msrb.mxu1 %v3392_v25  ;;  %v3746_v25 = vld [vmem:[%s4061_s23 + $0x18] sm:$0xff] }
 0x2d1   : > { %2159 = vmatpush.bf16.msra.mxu2 %v3380_v36  ;;  %2187 = vmatpush.bf16.msrb.mxu0 %v4504_v35 }
 0x2d3   : > { %2144 = vmatpush.bf16.msrb.mxu1 %v3384_v43  ;;  %p3599_p5 = scmp.ne.s32.totalorder %s4835_s27, 2 }
 0x2d4   : > { %s4836_s5 = sld [smem:[#allocation30_spill]] (!%p3599_p5) }
 0x2d5   : > { %2188 = vmatpush.bf16.msrb.mxu0 %v4517_v9  ;;  %2378 = vmatpush.bf16.msrb.mxu2 %v3750_v1  ;;  %s4837_s27 = sld [smem:[#allocation32_spill]] (!%p3599_p5) }
 0x2d6   : > { %s4838_s28 = sld [smem:[#allocation31_spill]] (!%p3599_p5) }
 0x2d7   : > { %2145 = vmatpush.bf16.msrb.mxu1 %v3376_v39  ;;  %v3744_v39 = vld [vmem:[%s4061_s23 + $0x8] sm:$0xff]  ;;  %s4840_s2 = sld [smem:[#allocation33_spill]] (!%p3599_p5) }
 0x2d9   : > { %2189 = vmatpush.bf16.msrb.mxu0 %v3412_v27  ;;  %v3749_v27 = vld [vmem:[%s4061_s23 + $0x30] sm:$0xff] }
 0x2da   : > { %2379 = vmatpush.bf16.msrb.mxu2 %v3749_v27 }
 0x2db   : > { %2316 = vmatpush.bf16.msra.mxu1 %v3758_v49 }
 0x2dd   : > { %2190 = vmatpush.bf16.msrb.mxu0 %v3404_v59  ;;  %v3747_v59 = vld [vmem:[%s4061_s23 + $0x20] sm:$0xff] }
 0x2de   : > { %2380 = vmatpush.bf16.msrb.mxu2 %v3748_v41 }
 0x2df   : > { %2317 = vmatpush.bf16.msra.mxu1 %v3757_v60 }
 0x2e1   : > { %2191 = vmatpush.bf16.msrb.mxu0 %v3396_v45 }
 0x2e2   : > { %2381 = vmatpush.bf16.msrb.mxu2 %v3747_v59 }
 0x2e3   : > { %2318 = vmatpush.bf16.msra.mxu1 %v3756_v55 }
 0x2e5   : > { %2192 = vmatpush.bf16.msrb.mxu0 %v3388_v33  ;;  %v3745_v33 = vld [vmem:[%s4061_s23 + $0x10] sm:$0xff] }
 0x2e6   : > { %2382 = vmatpush.bf16.msrb.mxu2 %v3746_v25 }
 0x2e7   : > { %2319 = vmatpush.bf16.msra.mxu1 %v3755_v19 }
 0x2e9   : > { %2193 = vmatpush.bf16.msrb.mxu0 %v3380_v36 }
 0x2ea   : > { %2383 = vmatpush.bf16.msrb.mxu2 %v3745_v33 }
 0x2eb   : > { %2320 = vmatpush.bf16.msra.mxu1 %v3754_v12 }
 0x2ee   : > { %2384 = vmatpush.bf16.msrb.mxu2 %v3744_v39 }
 0x2ef   : > { %2321 = vmatpush.bf16.msra.mxu1 %v3753_v47  ;;  %v3743_v47 = vld [vmem:[%s4061_s23] sm:$0xff] }
 0x2f2   : > { %2385 = vmatpush.bf16.msrb.mxu2 %v3743_v47 }
 0x2f3   : > { %2322 = vmatpush.bf16.msra.mxu1 %v3752_v2 }
 0x2f7   : > { %2323 = vmatpush.bf16.msra.mxu1 %v3751_v53 }
 0x2ff   : > { %v1933_v61 = vpop.f32.mrf.mxu1 }
 0x300   : > { %v4591_v26 = vadd.f32 %v3855_v37, %v1933_v61 }
 0x307   : > { %v1935_v35 = vpop.f32.mrf.mxu1 }
 0x310   : > { %v1947_v58 = vpop.f32.mrf.mxu2 }
 0x311   : > { %v4566_v23 = vadd.f32 %v1947_v58, %v4270_v62 }
 0x318   : > { %v1949_v9 = vpop.f32.mrf.mxu2 }
 0x319   : > { %v4574_v3 = vadd.f32 %v1949_v9, %v4272_v63 }
 0x337   : > { %v1961_v5 = vpop.f32.mrf.mxu1  ;;  %v1975_v51 = vpop.f32.mrf.mxu2 }
 0x338   : > { %v4569_v7 = vadd.f32 %v1961_v5, %v4304_v52  ;;  %v4582_v63 = vadd.f32 %v1975_v51, %v4308_v21  ;;  %v3856_v21 = vld [vmem:[#allocation2 + $0x8] sm:$0xff] }
 0x339   : > { %v4593_v57 = vadd.f32 %v3856_v21, %v1935_v35 }
 0x33a   : > { %v1994_v8 = vpack.c.bf16 %v4569_v7, %v4566_v23  ;;  %v1995_v15 = vpack.c.bf16 %v4582_v63, %v4582_v63 }
 0x33b   : > { %v2251_v44 = vpack.c.bf16 %v4593_v57, %v4591_v26 }
 0x33c   : > { %v2022_v13 = vunpack.c.l.b16 %v1994_v8  ;;  %v2134_v62 = vunpack.c.h.b16 %v1994_v8  ;;  %v2168_v31 = vunpack.c.l.b16 %v1995_v15 }
 0x33f   : > { %v1963_v6 = vpop.f32.mrf.mxu1  ;;  %v1977_v28 = vpop.f32.mrf.mxu2 }
 0x340   : > { %v4577_v10 = vadd.f32 %v1963_v6, %v4306_v20  ;;  %v4585_v20 = vadd.f32 %v1977_v28, %v4310_v22 }
 0x342   : > { %v1996_v11 = vpack.c.bf16 %v4577_v10, %v4574_v3  ;;  %v1997_v17 = vpack.c.bf16 %v4585_v20, %v4585_v20 }
 0x344   : > { %v2023_v14 = vunpack.c.l.b16 %v1996_v11  ;;  %v2135_v18 = vunpack.c.h.b16 %v1996_v11  ;;  %v2169_v54 = vunpack.c.l.b16 %v1997_v17 }
 0x346   : > { %v2024_v52 = vpack.c.b16 %v2023_v14, %v2022_v13  ;;  %v2136_v42 = vpack.c.b16 %v2135_v18, %v2134_v62  ;;  %v2170_v22 = vpack.c.b16 %v2169_v54, %v2168_v31 }
 0x348   : > { %2114 = vmatmul.bf16.vlgmr.msra.gmra.mxu3 %v2024_v52  ;;  %2128 = vmatmul.bf16.vlgmr.msra.gmra.mxu0 %v2024_v52 }
 0x349   : > { %2146 = vmatmul.bf16.vlgmr.msrb.gmra.mxu1 %v2136_v42  ;;  %2160 = vmatmul.bf16.vlgmr.msra.gmra.mxu2 %v2136_v42 }
 0x358   : > { %2180 = vmatmul.bf16.vlgmr.msrb.gmra.mxu3 %v2170_v22  ;;  %2194 = vmatmul.bf16.vlgmr.msrb.gmra.mxu0 %v2170_v22 }
 0x359   : > { %2324 = vmatmul.bf16.vlgmr.msra.gmra.mxu1 %v2251_v44 }
 0x3c5   : > { %v2129_v40 = vpop.f32.mrf.mxu0 }
 0x3c6   : > { %v2147_v56 = vpop.f32.mrf.mxu1  ;;  %v2130_v4 = vadd.f32 %v2129_v40, %v2017_v0 }
 0x3c7   : > { %v4605_v30 = vadd.f32 %v2147_v56, %v2016_v29 }
 0x3c8   : > { %v2200_v35 = vmul.f32 %v2130_v4, %v2130_v4 }
 0x3cb   : > { %v2115_v24 = vpop.f32.mrf.mxu3 }
 0x3cc   : > { %v4603_v50 = vadd.f32 %v2115_v24, %v2016_v29  ;;  %v2161_v45 = vpop.f32.mrf.mxu2 }
 0x3cd   : > { %v2162_v32 = vadd.f32 %v2161_v45, %v2017_v0  ;;  %v2131_v43 = vpop.f32.mrf.mxu0 }
 0x3ce   : > { %v2649_v16 = vmul.f32 %v2130_v4, %v4603_v50  ;;  %v2149_v38 = vpop.f32.mrf.mxu1  ;;  %v2132_v60 = vadd.f32 %v2131_v43, %v2017_v0 }
 0x3cf   : > { %v2651_v34 = vmul.f32 %v2162_v32, %v4605_v30  ;;  %v2202_v49 = vmul.f32 %v2162_v32, %v2162_v32  ;;  %v4613_v61 = vadd.f32 %v2149_v38, %v2016_v29  ;;  %v3589_v38 = vld [vmem:[%s4080_s7 + $0xa8] sm:$0xf] }
 0x3d0   : > { %v2201_v18 = vmul.f32 %v2132_v60, %v2132_v60 }
 0x3d1   : > { %v2653_v48 = vadd.f32 %v2651_v34, %v2649_v16  ;;  %v2204_v5 = vadd.f32 %v2202_v49, %v2200_v35  ;;  %v3780_v49 = vld [vmem:[%s4080_s7 + $0xac] sm:$0xf] }
 0x3d3   : > { %v2117_v36 = vpop.f32.mrf.mxu3 }
 0x3d4   : > { %v4611_v55 = vadd.f32 %v2117_v36, %v2016_v29  ;;  %v2163_v19 = vpop.f32.mrf.mxu2  ;;  %v3781_v36 = vld [vmem:[%s4080_s7 + $0xb0] sm:$0xf0] }
 0x3d5   : > { %v2164_v12 = vadd.f32 %v2163_v19, %v2017_v0  ;;  %v2195_v58 = vpop.f32.mrf.mxu0  ;;  %v3591_v19 = vld [vmem:[%s4080_s7 + $0xb4] sm:$0xf0] }
 0x3d6   : > { %v2650_v2 = vmul.f32 %v2132_v60, %v4611_v55  ;;  %v2196_v9 = vadd.f32 %v2195_v58, %v2017_v0  ;;  %v3590_v60 = vor.u32 %v3781_v36, %v3589_v38  ;;  %v3782_v58 = vld [vmem:[%s4080_s7 + $0xb8] sm:$0xf0]  ;;  %v3594_v47 = vor.u32 %v3780_v49, %v3591_v19  ;;  %v3529_v38 = vld [vmem:[%s4080_s7 + $0x30] sm:$0xf]  ;;  %v3765_v49 = vld [vmem:[%s4080_s7 + $0x34] sm:$0xf] }
 0x3d7   : > { %v2652_v53 = vmul.f32 %v2164_v12, %v4613_v61  ;;  %v2203_v13 = vmul.f32 %v2164_v12, %v2164_v12  ;;  %v3597_v12 = vld [vmem:[%s4080_s7 + $0xb0] sm:$0xf]  ;;  %v3766_v36 = vld [vmem:[%s4080_s7 + $0x38] sm:$0xf0] }
 0x3d8   : > { %v2206_v51 = vmul.f32 %v2196_v9, %v2196_v9  ;;  %v3598_v35 = vor.u32 %v3782_v58, %v3597_v12  ;;  %2607 = vmatpush.bf16.msra.mxu3 %v3590_v60  ;;  %2621 = vmatpush.bf16.msra.mxu0 %v3594_v47  ;;  %v3530_v19 = vor.u32 %v3766_v36, %v3529_v38  ;;  %v3531_v12 = vld [vmem:[%s4080_s7 + $0x3c] sm:$0xf0]  ;;  %v3537_v58 = vld [vmem:[%s4080_s7 + $0x38] sm:$0xf]  ;;  %v3767_v47 = vld [vmem:[%s4080_s7 + $0x40] sm:$0xf0] }
 0x3d9   : > { %v2654_v6 = vadd.f32 %v2652_v53, %v2650_v2  ;;  %v2205_v28 = vadd.f32 %v2203_v13, %v2201_v18  ;;  %v3577_v2 = vld [vmem:[%s4080_s7 + $0x90] sm:$0xf]  ;;  %v3777_v53 = vld [vmem:[%s4080_s7 + $0x94] sm:$0xf]  ;;  %v3775_v18 = vld [vmem:[%s4080_s7 + $0x80] sm:$0xf0] }
 0x3da   : > { %v2208_v8 = vadd.f32 %v2206_v51, %v2204_v5  ;;  %2635 = vmatpush.bf16.msrb.mxu1 %v3598_v35  ;;  %v3579_v51 = vld [vmem:[%s4080_s7 + $0x9c] sm:$0xf0]  ;;  %v3534_v35 = vor.u32 %v3765_v49, %v3531_v12 }
 0x3db   : > { %v2181_v11 = vpop.f32.mrf.mxu3 }
 0x3dc   : > { %3843 = vrsqrt.f32 %v2208_v8  ;;  %v4618_v62 = vadd.f32 %v2181_v11, %v2016_v29  ;;  %vm2217_vm12 = vcmp.eq.f32.partialorder %v2208_v8, inf  ;;  %v2220_v43 = vand.u32 2147483648, %v2208_v8 }
 0x3dd   : > { %v2197_v14 = vpop.f32.mrf.mxu0  ;;  %vm2219_vm14 = vcmp.eq.f32.partialorder %v2208_v8, 0.0  ;;  %v3582_v11 = vor.u32 %v3777_v53, %v3579_v51  ;;  %v3517_v53 = vld [vmem:[%s4080_s7 + $0x18] sm:$0xf]  ;;  %v3762_v51 = vld [vmem:[%s4080_s7 + $0x1c] sm:$0xf] }
 0x3de   : > { %v2655_v52 = vmul.f32 %v2196_v9, %v4618_v62  ;;  %v2198_v42 = vadd.f32 %v2197_v14, %v2017_v0  ;;  %v3778_v9 = vld [vmem:[%s4080_s7 + $0x98] sm:$0xf0]  ;;  %v3565_v14 = vld [vmem:[%s4080_s7 + $0x78] sm:$0xf] }
 0x3df   : > { %v3578_v5 = vor.u32 %v3778_v9, %v3577_v2  ;;  %2622 = vmatpush.bf16.msra.mxu0 %v3582_v11  ;;  %v3538_v2 = vor.u32 %v3767_v47, %v3537_v58  ;;  %v3519_v11 = vld [vmem:[%s4080_s7 + $0x24] sm:$0xf0] }
 0x3e0   : > { %v2207_v15 = vmul.f32 %v2198_v42, %v2198_v42  ;;  %v4621_v17 = vadd.f32 %v2655_v52, %v2653_v48  ;;  %v3774_v52 = vld [vmem:[%s4080_s7 + $0x7c] sm:$0xf] }
 0x3e1   : > { %2608 = vmatpush.bf16.msra.mxu3 %v3578_v5  ;;  %v3763_v5 = vld [vmem:[%s4080_s7 + $0x20] sm:$0xf0] }
 0x3e2   : > { %v3844_v31 = vpop.eup %3843  ;;  %v2209_v54 = vadd.f32 %v2207_v15, %v2205_v28  ;;  %v3567_v28 = vld [vmem:[%s4080_s7 + $0x84] sm:$0xf0]  ;;  %v3573_v15 = vld [vmem:[%s4080_s7 + $0x80] sm:$0xf] }
 0x3e3   : > { %v2183_v37 = vpop.f32.mrf.mxu3  ;;  %v2211_v21 = vmul.f32 %v3844_v31, %v2208_v8 }
 0x3e4   : > { %3845 = vrsqrt.f32 %v2209_v54  ;;  %v4623_v22 = vadd.f32 %v2183_v37, %v2016_v29  ;;  %vm2229_vm13 = vcmp.eq.f32.partialorder %v2209_v54, inf  ;;  %v2232_v33 = vand.u32 2147483648, %v2209_v54 }
 0x3e5   : > { %v2212_v44 = vmul.f32 %v3844_v31, %v2211_v21  ;;  %vm2231_vm15 = vcmp.eq.f32.partialorder %v2209_v54, 0.0  ;;  %v3553_v21 = vld [vmem:[%s4080_s7 + $0x60] sm:$0xf] }
 0x3e6   : > { %v2656_v1 = vmul.f32 %v2198_v42, %v4623_v22  ;;  %v3566_v42 = vor.u32 %v3775_v18, %v3565_v14  ;;  %v3522_v14 = vor.u32 %v3762_v51, %v3519_v11  ;;  %v3764_v18 = vld [vmem:[%s4080_s7 + $0x28] sm:$0xf0] }
 0x3e7   : > { %v2213_v27 = vmul.f32 0.5, %v2212_v44  ;;  %v3772_v44 = vld [vmem:[%s4080_s7 + $0x68] sm:$0xf0] }
 0x3e8   : > { %v4626_v41 = vadd.f32 %v2656_v1, %v2654_v6  ;;  %v3585_v6 = vld [vmem:[%s4080_s7 + $0x98] sm:$0xf]  ;;  %2609 = vmatpush.bf16.msra.mxu3 %v3566_v42  ;;  %v3771_v1 = vld [vmem:[%s4080_s7 + $0x64] sm:$0xf] }
 0x3e9   : > { %v2214_v46 = vsub.f32 1.5, %v2213_v27  ;;  %v3554_v27 = vor.u32 %v3772_v44, %v3553_v21  ;;  %v3507_v44 = vld [vmem:[%s4080_s7 + $0xc] sm:$0xf0] }
 0x3ea   : > { %v3846_v40 = vpop.eup %3845 }
 0x3eb   : > { %v2223_v59 = vmul.f32 %v3846_v40, %v2209_v54  ;;  %v2215_v0 = vmul.f32 %v3844_v31, %v2214_v46  ;;  %v3776_v31 = vld [vmem:[%s4080_s7 + $0x88] sm:$0xf0]  ;;  %v3555_v46 = vld [vmem:[%s4080_s7 + $0x6c] sm:$0xf0] }
 0x3ec   : > { %v3574_v37 = vor.u32 %v3776_v31, %v3573_v15  ;;  %2610 = vmatpush.bf16.msra.mxu3 %v3554_v27  ;;  %v3505_v15 = vld [vmem:[%s4080_s7] sm:$0xf]  ;;  %v3760_v31 = vld [vmem:[%s4080_s7 + $0x8] sm:$0xf0]  ;;  %v3761_v27 = vld [vmem:[%s4080_s7 + $0x10] sm:$0xf0] }
 0x3ed   : > { %v2224_v56 = vmul.f32 %v3846_v40, %v2223_v59  ;;  %v2216_v24 = vmul.f32 %v2215_v0, %v2208_v8  ;;  %v3773_v59 = vld [vmem:[%s4080_s7 + $0x70] sm:$0xf0]  ;;  %v3558_v0 = vor.u32 %v3771_v1, %v3555_v46  ;;  %v3506_v21 = vor.u32 %v3760_v31, %v3505_v15  ;;  %v3513_v1 = vld [vmem:[%s4080_s7 + $0x8] sm:$0xf] }
 0x3ef   : > { %v2225_v25 = vmul.f32 0.5, %v2224_v56  ;;  %v2218_v29 = vsel %vm2217_vm12, %v2208_v8, %v2216_v24  ;;  %v3779_v8 = vld [vmem:[%s4080_s7 + $0xa0] sm:$0xf0]  ;;  %v3769_v24 = vld [vmem:[%s4080_s7 + $0x50] sm:$0xf0] }
 0x3f0   : > { %v2221_v34 = vsel %vm2219_vm14, %v2220_v43, %v2218_v29  ;;  %v3586_v13 = vor.u32 %v3779_v8, %v3585_v6  ;;  %v3543_v29 = vld [vmem:[%s4080_s7 + $0x54] sm:$0xf0]  ;;  %v3770_v43 = vld [vmem:[%s4080_s7 + $0x58] sm:$0xf0]  ;;  %v3518_v8 = vor.u32 %v3763_v5, %v3517_v53 }
 0x3f1   : > { %v2226_v4 = vsub.f32 1.5, %v2225_v25  ;;  %v3541_v25 = vld [vmem:[%s4080_s7 + $0x48] sm:$0xf] }
 0x3f2   : > { %2636 = vmatpush.bf16.msrb.mxu1 %v3586_v13  ;;  %v3525_v13 = vld [vmem:[%s4080_s7 + $0x20] sm:$0xf] }
 0x3f3   : > { %v2227_v45 = vmul.f32 %v3846_v40, %v2226_v4  ;;  %v3561_v40 = vld [vmem:[%s4080_s7 + $0x68] sm:$0xf]  ;;  %v3768_v4 = vld [vmem:[%s4080_s7 + $0x4c] sm:$0xf] }
 0x3f4   : > { %v3562_v56 = vor.u32 %v3773_v59, %v3561_v40  ;;  %v3514_v40 = vor.u32 %v3761_v27, %v3513_v1 }
 0x3f5   : > { %v2228_v32 = vmul.f32 %v2227_v45, %v2209_v54  ;;  %v3542_v45 = vor.u32 %v3769_v24, %v3541_v25 }
 0x3f6   : > { %2637 = vmatpush.bf16.msrb.mxu1 %v3574_v37 }
 0x3f7   : > { %v2230_v16 = vsel %vm2229_vm13, %v2209_v54, %v2228_v32  ;;  %v3570_v54 = vor.u32 %v3774_v52, %v3567_v28  ;;  %v3549_v32 = vld [vmem:[%s4080_s7 + $0x50] sm:$0xf]  ;;  %2611 = vmatpush.bf16.msra.mxu3 %v3542_v45  ;;  %v3526_v52 = vor.u32 %v3764_v18, %v3525_v13 }
 0x3f8   : > { %v2233_v48 = vsel %vm2231_vm15, %v2232_v33, %v2230_v16  ;;  %v2325_v33 = vpop.f32.mrf.mxu1  ;;  %v3546_v16 = vor.u32 %v3768_v4, %v3543_v29 }
 0x3f9   : > { %v2234_v39 = vpack.c.bf16 %v2233_v48, %v2221_v34  ;;  %2623 = vmatpush.bf16.msra.mxu0 %v3570_v54  ;;  %v3550_v34 = vor.u32 %v3770_v43, %v3549_v32  ;;  %v3834_v48 = vld [vmem:[%s799_s26] ss:$0 sm:$0xff]  ;;  %v3759_v54 = vld [vmem:[%s4080_s7 + $0x4] sm:$0xf]  ;;  %s4839_s7 = sld [smem:[#allocation24_spill]] (!%p3599_p5) }
 0x3fa   : > { %2638 = vmatpush.bf16.msrb.mxu1 %v3562_v56  ;;  %v3510_v46 = vor.u32 %v3759_v54, %v3507_v44 }
 0x3fb   : > { %2386 = vmatmul.bf16.vlgmr.msrb.gmra.mxu2 %v2234_v39  ;;  %2612 = vmatpush.bf16.msra.mxu3 %v3530_v19 }
 0x3fd   : > { %2624 = vmatpush.bf16.msra.mxu0 %v3558_v0 }
 0x3fe   : > { %2639 = vmatpush.bf16.msrb.mxu1 %v3550_v34 }
 0x3ff   : > { %2613 = vmatpush.bf16.msra.mxu3 %v3518_v8  ;;  %v2471_v8 = vld [vmem:[%s4834_s20] sm:$0x7] }
 0x400   : > { %v2327_v42 = vpop.f32.mrf.mxu1  ;;  %v2474_v11 = vperm.slane %v2471_v8, 1  ;;  %v2475_v18 = vperm.slane %v2471_v8, 2 }
 0x401   : > { %2625 = vmatpush.bf16.msra.mxu0 %v3546_v16 }
 0x402   : > { %2640 = vmatpush.bf16.msrb.mxu1 %v3538_v2 }
 0x403   : > { %2614 = vmatpush.bf16.msra.mxu3 %v3506_v21 }
 0x405   : > { %2626 = vmatpush.bf16.msra.mxu0 %v3534_v35 }
 0x406   : > { %2641 = vmatpush.bf16.msrb.mxu1 %v3526_v52 }
 0x409   : > { %2627 = vmatpush.bf16.msra.mxu0 %v3522_v14 }
 0x40a   : > { %2642 = vmatpush.bf16.msrb.mxu1 %v3514_v40 }
 0x40d   : > { %2628 = vmatpush.bf16.msra.mxu0 %v3510_v46 }
 0x47e   : > { %v2387_v39 = vpop.f32.mrf.mxu2 }
 0x47f   : > { %v2388_v60 = vadd.f32 %v2387_v39, %v2325_v33 }
 0x481   : > { %v4669_v9 = vadd.f32 %v3834_v48, %v2388_v60 }
 0x483   : > { %v3501_v6 = vmul.f32 -1.442695, %v4669_v9 }
 0x485   : > { %3847 = vpow2.f32 %v3501_v6 }
 0x486   : > { %v2389_v28 = vpop.f32.mrf.mxu2 }
 0x487   : > { %v2390_v37 = vadd.f32 %v2389_v28, %v2327_v42  ;;  %v2473_v28 = vperm.slane %v2471_v8, 0 }
 0x489   : > { %v2397_v59 = vadd.f32 %v3834_v48, %v2390_v37 }
 0x48b   : > { %v3848_v0 = vpop.eup %3847  ;;  %v3502_v56 = vmul.f32 -1.442695, %v2397_v59 }
 0x48c   : > { %v2404_v25 = vadd.f32 1.0, %v3848_v0 }
 0x48d   : > { %3849 = vpow2.f32 %v3502_v56 }
 0x48e   : > { %3851 = vrcp.f32 %v2404_v25  ;;  %v2417_v48 = vand.u32 2147483648, %v2404_v25  ;;  %vm2411_vm1 = vweird.f32 %v2404_v25  ;;  %v2415_v39 = vand.u32 2147483647, %v2404_v25 }
 0x490   : > { %v2418_v12 = vor.u32 1.1754944e-38, %v2417_v48  ;;  %vm2416_vm4 = vcmp.eq.f32.partialorder %v2415_v39, 8.507059e+37 }
 0x493   : > { %v3850_v24 = vpop.eup %3849 }
 0x494   : > { %v3852_v4 = vpop.eup %3851  ;;  %v2405_v45 = vadd.f32 1.0, %v3850_v24 }
 0x495   : > { %v2407_v29 = vmul.f32 %v3852_v4, %v2404_v25  ;;  %vm2412_vm0 = vweird.f32 %v3852_v4 }
 0x496   : > { %3853 = vrcp.f32 %v2405_v45  ;;  %vm2413_vm2 = vmor %vm2411_vm1, %vm2412_vm0  ;;  %v2432_v36 = vand.u32 2147483648, %v2405_v45  ;;  %v2430_v19 = vand.u32 2147483647, %v2405_v45  ;;  %vm2426_vm5 = vweird.f32 %v2405_v45 }
 0x497   : > { %v2408_v32 = vsub.f32 1.0, %v2407_v29 }
 0x498   : > { %v2433_v35 = vor.u32 1.1754944e-38, %v2432_v36  ;;  %vm2431_vm7 = vcmp.eq.f32.partialorder %v2430_v19, 8.507059e+37 }
 0x499   : > { %v2409_v43 = vmul.f32 %v3852_v4, %v2408_v32 }
 0x49b   : > { %v2410_v16 = vadd.f32 %v3852_v4, %v2409_v43 }
 0x49c   : > { %v3854_v33 = vpop.eup %3853 }
 0x49d   : > { %v2422_v34 = vmul.f32 %v3854_v33, %v2405_v45  ;;  %v2414_v49 = vsel %vm2413_vm2, %v3852_v4, %v2410_v16  ;;  %vm2427_vm3 = vweird.f32 %v3854_v33 }
 0x49e   : > { %v2419_v47 = vsel %vm2416_vm4, %v2418_v12, %v2414_v49  ;;  %vm2428_vm6 = vmor %vm2426_vm5, %vm2427_vm3 }
 0x49f   : > { %v2423_v38 = vsub.f32 1.0, %v2422_v34  ;;  %v2436_v5 = vmul.f32 %v2419_v47, %v4669_v9 }
 0x4a1   : > { %v2424_v60 = vmul.f32 %v3854_v33, %v2423_v38 }
 0x4a3   : > { %v2425_v58 = vadd.f32 %v3854_v33, %v2424_v60 }
 0x4a5   : > { %v2429_v2 = vsel %vm2428_vm6, %v3854_v33, %v2425_v58 }
 0x4a6   : > { %v2434_v53 = vsel %vm2431_vm7, %v2433_v35, %v2429_v2 }
 0x4a7   : > { %v2437_v51 = vmul.f32 %v2434_v53, %v2397_v59 }
 0x4a9   : > { %v2438_v6 = vpack.c.bf16 %v2437_v51, %v2436_v5 }
 0x4ab   : > { %2615 = vmatmul.bf16.vlgmr.msra.gmra.mxu3 %v2438_v6  ;;  %2629 = vmatmul.bf16.vlgmr.msra.gmra.mxu0 %v2438_v6 }
 0x4ac   : > { %2643 = vmatmul.bf16.vlgmr.msrb.gmra.mxu1 %v2438_v6 }
 0x528   : > { %v2630_v13 = vpop.f32.mrf.mxu0 }
 0x529   : > { %v2631_v14 = vadd.f32 %v2630_v13, %v2474_v11  ;;  %v2644_v52 = vpop.f32.mrf.mxu1 }
 0x52a   : > { %v2645_v15 = vadd.f32 %v2644_v52, %v2475_v18 }
 0x52b   : > { %v2659_v42 = vmul.f32 %v4621_v17, %v2631_v14 }
 0x52d   : > { %v2661_v9 = vadd.f32 %v2659_v42, %v4591_v26 }
 0x52e   : > { %v2616_v31 = vpop.f32.mrf.mxu3 }
 0x52f   : > { %v2663_v54 = vadd.f32 %v2661_v9, %v2645_v15  ;;  %v2617_v37 = vadd.f32 %v2616_v31, %v2473_v28 }
 0x530   : > { %v2632_v21 = vpop.f32.mrf.mxu0 }
 0x531   : > { %2665 = vst [vmem:[#allocation2] sm:$0xff] %v2663_v54  ;;  %v2667_v44 = vmul.f32 %v2617_v37, %v4603_v50  ;;  %v2673_v1 = vmul.f32 %v2617_v37, %v4605_v30  ;;  %v2679_v27 = vmul.f32 %v2617_v37, %v4618_v62  ;;  %v2633_v46 = vadd.f32 %v2632_v21, %v2474_v11  ;;  %v2646_v40 = vpop.f32.mrf.mxu1 }
 0x532   : > { %v2647_v56 = vadd.f32 %v2646_v40, %v2475_v18 }
 0x533   : > { %v2669_v59 = vadd.f32 %v2667_v44, %v4566_v23  ;;  %v2675_v17 = vadd.f32 %v2673_v1, %v4569_v7  ;;  %v2681_v0 = vadd.f32 %v2679_v27, %v4582_v63  ;;  %v2660_v26 = vmul.f32 %v4626_v41, %v2633_v46 }
 0x535   : > { %2671 = vst [vmem:[#allocation3 + $0x48] sm:$0xff] %v2669_v59  ;;  %v2662_v25 = vadd.f32 %v2660_v26, %v4593_v57 }
 0x536   : > { %2677 = vst [vmem:[#allocation3 + $0x18] sm:$0xff] %v2675_v17  ;;  %v2618_v50 = vpop.f32.mrf.mxu3 }
 0x537   : > { %2683 = vst [vmem:[#allocation3] sm:$0xff] %v2681_v0  ;;  %v2664_v30 = vadd.f32 %v2662_v25, %v2647_v56  ;;  %v2619_v24 = vadd.f32 %v2618_v50, %v2473_v28 }
 0x539   : > { %2666 = vst [vmem:[#allocation2 + $0x8] sm:$0xff] %v2664_v30  ;;  %v2668_v62 = vmul.f32 %v2619_v24, %v4611_v55  ;;  %v2674_v23 = vmul.f32 %v2619_v24, %v4613_v61  ;;  %v2680_v7 = vmul.f32 %v2619_v24, %v4623_v22 }
 0x53b   : > { %v2670_v63 = vadd.f32 %v2668_v62, %v4574_v3  ;;  %v2676_v41 = vadd.f32 %v2674_v23, %v4577_v10  ;;  %v2682_v4 = vadd.f32 %v2680_v7, %v4585_v20  ;;  %2688 = sbr.rel (%p3599_p5) target bundleno = 1816 (0x718), region = 176 }
 0x53d   : > { %2672 = vst [vmem:[#allocation3 + $0x8] sm:$0xff] %v2670_v63 }
 0x53e   : > { %2678 = vst [vmem:[#allocation3 + $0x58] sm:$0xff] %v2676_v41 }
 0x53f   : > { %2684 = vst [vmem:[#allocation3 + $0x38] sm:$0xff] %v2682_v4 }
 0x540   : > { %v3790_v57 = vld [vmem:[%s4836_s5 + $0x38] sm:$0xff]  ;;  %v3789_v55 = vld [vmem:[%s4836_s5 + $0x30] sm:$0xff]  ;;  %v3788_v3 = vld [vmem:[%s4836_s5 + $0x28] sm:$0xff]  ;;  %v2689_v29 = vpack.c.bf16 %v2664_v30, %v2663_v54  ;;  %vm2919_vm1 = vcmask 1024  }
 0x541   : > { %2758 = vmatpush.bf16.msra.mxu0 %v3790_v57  ;;  %v3787_v10 = vld [vmem:[%s4836_s5 + $0x20] sm:$0xff]  ;;  %v3786_v20 = vld [vmem:[%s4836_s5 + $0x18] sm:$0xff]  ;;  %v3785_v61 = vld [vmem:[%s4836_s5 + $0x10] sm:$0xff] }
 0x542   : > { %v3784_v22 = vld [vmem:[%s4836_s5 + $0x8] sm:$0xff]  ;;  %v3783_v45 = vld [vmem:[%s4836_s5] sm:$0xff]  ;;  %v3798_v32 = vld [vmem:[%s4837_s27 + $0x38] sm:$0xff] }
 0x543   : > { %2881 = vmatpush.bf16.msra.mxu1 %v3798_v32  ;;  %v3797_v43 = vld [vmem:[%s4837_s27 + $0x30] sm:$0xff]  ;;  %v3796_v33 = vld [vmem:[%s4837_s27 + $0x28] sm:$0xff]  ;;  %v3795_v16 = vld [vmem:[%s4837_s27 + $0x20] sm:$0xff] }
 0x544   : > { %v3794_v34 = vld [vmem:[%s4837_s27 + $0x18] sm:$0xff]  ;;  %v3857_v48 = vld [vmem:[%s4838_s28] ss:$0 sm:$0xff]  ;;  %v3793_v39 = vld [vmem:[%s4837_s27 + $0x10] sm:$0xff] }
 0x545   : > { %2759 = vmatpush.bf16.msra.mxu0 %v3789_v55  ;;  %v3792_v49 = vld [vmem:[%s4837_s27 + $0x8] sm:$0xff]  ;;  %v3791_v19 = vld [vmem:[%s4837_s27] sm:$0xff] }
 0x546   : > { %v3858_v26 = vld [vmem:[#allocation9] ss:$0 sm:$0xff] }
 0x547   : > { %2882 = vmatpush.bf16.msra.mxu1 %v3797_v43  ;;  %v2895_v30 = vld [vmem:[%s4839_s7] sm:$0x3] }
 0x549   : > { %2760 = vmatpush.bf16.msra.mxu0 %v3788_v3 }
 0x54b   : > { %2883 = vmatpush.bf16.msra.mxu1 %v3796_v33 }
 0x54d   : > { %2761 = vmatpush.bf16.msra.mxu0 %v3787_v10 }
 0x54f   : > { %2884 = vmatpush.bf16.msra.mxu1 %v3795_v16 }
 0x551   : > { %2762 = vmatpush.bf16.msra.mxu0 %v3786_v20 }
 0x553   : > { %2885 = vmatpush.bf16.msra.mxu1 %v3794_v34 }
 0x555   : > { %2763 = vmatpush.bf16.msra.mxu0 %v3785_v61 }
 0x557   : > { %2886 = vmatpush.bf16.msra.mxu1 %v3793_v39 }
 0x559   : > { %2764 = vmatpush.bf16.msra.mxu0 %v3784_v22 }
 0x55b   : > { %2887 = vmatpush.bf16.msra.mxu1 %v3792_v49 }
 0x55d   : > { %2765 = vmatpush.bf16.msra.mxu0 %v3783_v45 }
 0x55f   : > { %2888 = vmatpush.bf16.msra.mxu1 %v3791_v19 }
 0x560   : > { %2766 = vmatmul.bf16.vlgmr.msra.gmra.mxu0 %v2689_v29 }
 0x5dd   : > { %v2767_v38 = vpop.f32.mrf.mxu0 }
 0x5de   : > { %v2768_v36 = vadd.f32 %v3857_v48, %v2767_v38 }
 0x5e0   : > { %v3632_v60 = vmul.f32 -1.442695, %v2768_v36 }
 0x5e2   : > { %3859 = vpow2.f32 %v3632_v60 }
 0x5e5   : > { %v2769_v12 = vpop.f32.mrf.mxu0 }
 0x5e6   : > { %v2770_v58 = vadd.f32 %v3857_v48, %v2769_v12 }
 0x5e8   : > { %v3860_v47 = vpop.eup %3859  ;;  %v3633_v35 = vmul.f32 -1.442695, %v2770_v58 }
 0x5e9   : > { %v2778_v2 = vadd.f32 1.0, %v3860_v47 }
 0x5ea   : > { %3861 = vpow2.f32 %v3633_v35 }
 0x5eb   : > { %3863 = vrcp.f32 %v2778_v2  ;;  %v2791_v52 = vand.u32 2147483648, %v2778_v2  ;;  %vm2785_vm9 = vweird.f32 %v2778_v2  ;;  %v2789_v42 = vand.u32 2147483647, %v2778_v2 }
 0x5ed   : > { %v2792_v37 = vor.u32 1.1754944e-38, %v2791_v52  ;;  %vm2790_vm13 = vcmp.eq.f32.partialorder %v2789_v42, 8.507059e+37 }
 0x5f0   : > { %v3862_v53 = vpop.eup %3861 }
 0x5f1   : > { %v3864_v5 = vpop.eup %3863  ;;  %v2779_v51 = vadd.f32 1.0, %v3862_v53 }
 0x5f2   : > { %v2781_v6 = vmul.f32 %v3864_v5, %v2778_v2  ;;  %vm2786_vm8 = vweird.f32 %v3864_v5 }
 0x5f3   : > { %3865 = vrcp.f32 %v2779_v51  ;;  %vm2787_vm11 = vmor %vm2785_vm9, %vm2786_vm8  ;;  %v2806_v15 = vand.u32 2147483648, %v2779_v51  ;;  %v2804_v54 = vand.u32 2147483647, %v2779_v51  ;;  %vm2800_vm14 = vweird.f32 %v2779_v51 }
 0x5f4   : > { %v2782_v8 = vsub.f32 1.0, %v2781_v6 }
 0x5f5   : > { %v2807_v1 = vor.u32 1.1754944e-38, %v2806_v15  ;;  %vm2805_vm0 = vcmp.eq.f32.partialorder %v2804_v54, 8.507059e+37 }
 0x5f6   : > { %v2783_v11 = vmul.f32 %v3864_v5, %v2782_v8 }
 0x5f8   : > { %v2784_v14 = vadd.f32 %v3864_v5, %v2783_v11 }
 0x5f9   : > { %v3866_v13 = vpop.eup %3865 }
 0x5fa   : > { %v2796_v18 = vmul.f32 %v3866_v13, %v2779_v51  ;;  %v2788_v9 = vsel %vm2787_vm11, %v3864_v5, %v2784_v14  ;;  %vm2801_vm12 = vweird.f32 %v3866_v13 }
 0x5fb   : > { %v2793_v44 = vsel %vm2790_vm13, %v2792_v37, %v2788_v9  ;;  %vm2802_vm15 = vmor %vm2800_vm14, %vm2801_vm12 }
 0x5fc   : > { %v2797_v28 = vsub.f32 1.0, %v2796_v18  ;;  %v2810_v40 = vmul.f32 %v2793_v44, %v2768_v36 }
 0x5fe   : > { %v2798_v31 = vmul.f32 %v3866_v13, %v2797_v28 }
 0x600   : > { %v2799_v21 = vadd.f32 %v3866_v13, %v2798_v31 }
 0x602   : > { %v2803_v27 = vsel %vm2802_vm15, %v3866_v13, %v2799_v21 }
 0x603   : > { %v2808_v46 = vsel %vm2805_vm0, %v2807_v1, %v2803_v27 }
 0x604   : > { %v2811_v59 = vmul.f32 %v2808_v46, %v2770_v58 }
 0x606   : > { %v2812_v17 = vpack.c.bf16 %v2811_v59, %v2810_v40 }
 0x608   : > { %2889 = vmatmul.bf16.vlgmr.msra.gmra.mxu1 %v2812_v17 }
 0x685   : > { %v2890_v0 = vpop.f32.mrf.mxu1 }
 0x686   : > { %v2891_v50 = vadd.f32 %v3858_v26, %v2890_v0 }
 0x68d   : > { %v2892_v56 = vpop.f32.mrf.mxu1 }
 0x68e   : > { %v2893_v25 = vadd.f32 %v3858_v26, %v2892_v56 }
 0x690   : > { %2913 = vmatpush.msra.mxu2 %v2893_v25 }
 0x692   : > { %2914 = vmatpush.msra.mxu2 %v2891_v50 }
 0x693   : > { %3666 = vmatmul.msk.f32.vlgmr.msra.gmra.mxu2 %vm1495_vm10, %v2895_v30 }
 0x716   : > { %v2916_v24 = vpop.f32.mrf.mxu2 }
 0x717   : > { %2920 = vst.msk [vmem:[%s4840_s2] sm:$0x3] %vm2919_vm1, %v2916_v24 }
 0x718 PF: > { %s4841_s0 = sld [smem:[#allocation16_spill]] }
 0x71e   : > { %s34_s29 = sadd.s32 1, %s4841_s0  }
 0x71f   : > { %p31_p6 = scmp.ge.s32.totalorder %s34_s29, 5  }
 0x721   :  { %33 = sbr.rel (!%p31_p6) target bundleno = 15 (0xf), region = 254 }
 0x726   :  { %2932 = vsyncmov [#allocation8] }
 0x729   :  { %s2933_s30 = vpop.sfrf %2932 }
 0x72a   :  { %p3669_p7 = scmp.ne.s32.totalorder %s2933_s30, 0 }
 0x72c   :  { %2937 = shalt.err (%p3669_p7)  }
 0x72d   :  { %2939 = vsyncmov [#allocation8 + $0x1] }
 0x730   :  { %s2940_s3 = vpop.sfrf %2939 }
 0x731   :  { %p3670_p8 = scmp.ne.s32.totalorder %s2940_s3, 0 }
 0x733   :  { %2944 = shalt.err (%p3670_p8)  }
 0x734   :  { %2946 = vsyncmov [#allocation8 + $0x2] }
 0x737   :  { %s2947_s11 = vpop.sfrf %2946 }
 0x738   :  { %p3671_p9 = scmp.ne.s32.totalorder %s2947_s11, 0 }
 0x73a   :  { %2951 = shalt.err (%p3671_p9)  }

</bundles_post_ra>
